<compile_context>
chip_gen: v7x
topology: tpu7x:2x2x1
jax: 0.10.0
libtpu: 0.0.40
codegen_flags: <defaults>
</compile_context>

<pallas_src>
import functools

import numpy as np
import jax
import jax.numpy as jnp
from jax.experimental import pallas as pl
from jax.experimental.pallas import tpu as pltpu

EPS = 1e-6
SIZES = (1, 2, 3, 6)
S_MAX = max(s * s for s in SIZES)  # 36


# ---------------------------------------------------------------------------
# Deterministic glue: pooling / bilinear matrices reproducing PyTorch
# AdaptiveAvgPool2d and F.interpolate(bilinear, align_corners=False).
# ---------------------------------------------------------------------------
def _adaptive_pool_matrix(in_size: int, out_size: int) -> np.ndarray:
    m = np.zeros((out_size, in_size), dtype=np.float32)
    for i in range(out_size):
        start = (i * in_size) // out_size
        end = -((-(i + 1) * in_size) // out_size)  # ceil((i+1)*in/out)
        m[i, start:end] = 1.0 / (end - start)
    return m


def _bilinear_matrix(out_size: int, in_size: int) -> np.ndarray:
    m = np.zeros((out_size, in_size), dtype=np.float32)
    scale = in_size / out_size
    for i in range(out_size):
        src = (i + 0.5) * scale - 0.5
        if src < 0.0:
            src = 0.0
        i0 = int(np.floor(src))
        i1 = min(i0 + 1, in_size - 1)
        lam = src - i0
        m[i, i0] += 1.0 - lam
        m[i, i1] += lam
    return m


def _round_up(x: int, m: int) -> int:
    return (x + m - 1) // m * m


@functools.lru_cache(maxsize=16)
def _upsample_matrices(H: int, W: int, HWp: int):
    """Cached device bf16 (4, 36, HWp): per-scale bilinear-upsample rows."""
    HW = H * W
    mats = []
    for s in SIZES:
        lh = _bilinear_matrix(H, s)                       # (H, s)
        lw = _bilinear_matrix(W, s)                       # (W, s)
        u = np.kron(lh, lw).T                             # (s*s, H*W)
        u = np.pad(u, ((0, S_MAX - s * s), (0, HWp - HW)))
        mats.append(u)
    return jnp.asarray(np.stack(mats, axis=0), dtype=jnp.bfloat16)


def _vmem_capacity_bytes() -> int:
    try:
        return int(pltpu.get_tpu_info().vmem_capacity_bytes)
    except Exception:
        return 64 * 1024 * 1024  # conservative default (v7x per-core VMEM)


def _choose_tile(HW: int, tile_hw, phys_vmem: int):
    """Pick a lane-dense pixel tile; divide HW exactly when possible."""
    if tile_hw is None:
        tile_max = 2048 if phys_vmem >= 96 * 1024 * 1024 else 1024
    else:
        tile_max = int(tile_hw)
    tile_max = max(128, (tile_max // 128) * 128)
    if HW % 128 == 0:
        best, t, limit = 128, 128, min(HW, tile_max)
        while t <= limit:
            if HW % t == 0:
                best = t
            t += 128
        return best, HW                                   # no padding, no slice
    tile = min(tile_max, _round_up(HW, 128))
    return tile, _round_up(HW, tile)


# ---------------------------------------------------------------------------
# Pallas kernel: per-pixel hot path on (C, TP) tiles (channels x pixels).
#   feat_ref : (1, C, TP)         bf16   pixel tile of the input feature
#   u_ref    : (4, 36, TP)        bf16   per-scale bilinear-upsample rows
#   g_ref    : (1, 4, 2C, 36)     bf16   [scale grid ; weight_net @ scale grid]
#   ww_ref   : (C, C)             bf16   weight_net 1x1 conv matrix
#   bw_ref   : (C, 1)             f32    weight_net bias
#   wb1_ref  : (O, C)             bf16   bottleneck rows for fused channels
#   wb2_ref  : (O, C)             bf16   bottleneck rows for raw feature
#   bb_ref   : (O, 1)             f32    bottleneck bias
#   out_ref  : (1, O, TP)         out_dtype (bf16 by default)
# ---------------------------------------------------------------------------
def _ctx_kernel(feat_ref, u_ref, g_ref, ww_ref, bw_ref,
                wb1_ref, wb2_ref, bb_ref, out_ref):
    C = ww_ref.shape[0]
    feat = feat_ref[0]                                    # (C, TP) bf16

    # weight_net applied to the raw feature once: Ww @ feat + b
    fw = jnp.dot(ww_ref[...], feat,
                 preferred_element_type=jnp.float32) + bw_ref[...]   # (C, TP) f32

    num = jnp.zeros(fw.shape, jnp.float32)
    den = jnp.zeros(fw.shape, jnp.float32)
    for s in range(len(SIZES)):                           # static unroll, 4 scales
        u = u_ref[s]                                      # (36, TP) bf16
        gm = g_ref[0, s]                                  # (2C, 36) bf16: [g ; Ww@g]
        both = jnp.dot(gm, u, preferred_element_type=jnp.float32)    # (2C, TP)
        ms, msw = both[:C], both[C:]                      # upsampled scale, Ww@scale
        # sigmoid(Ww @ (feat - ms) + b) == sigmoid(fw - msw); bf16 arg -> bf16 EUP.
        w = jax.nn.sigmoid((fw - msw).astype(jnp.bfloat16))
        num = num + ms * w
        den = den + w
    fused = num * pl.reciprocal(den + EPS, approx=True)

    out = (jnp.dot(wb1_ref[...], fused.astype(jnp.bfloat16),
                   preferred_element_type=jnp.float32)
           + jnp.dot(wb2_ref[...], feat, preferred_element_type=jnp.float32)
           + bb_ref[...])
    out_ref[0] = jnp.maximum(out, 0.0).astype(out_ref.dtype)


def _build_ctx_call(N, C, O, HWp, tile_hw, out_dtype, vmem_limit, single_buf):
    NS = len(SIZES)

    def const_spec(shape, index_map):
        if single_buf:
            try:
                return pl.BlockSpec(shape, index_map, pipeline_mode=pl.Buffered(1))
            except TypeError:
                pass
        return pl.BlockSpec(shape, index_map)

    in_specs = [
        pl.BlockSpec((1, C, tile_hw), lambda n, t: (n, 0, t)),
        pl.BlockSpec((NS, S_MAX, tile_hw), lambda n, t: (0, 0, t)),
        pl.BlockSpec((1, NS, 2 * C, S_MAX), lambda n, t: (n, 0, 0, 0)),
        const_spec((C, C), lambda n, t: (0, 0)),
        const_spec((C, 1), lambda n, t: (0, 0)),
        const_spec((O, C), lambda n, t: (0, 0)),
        const_spec((O, C), lambda n, t: (0, 0)),
        const_spec((O, 1), lambda n, t: (0, 0)),
    ]
    return pl.pallas_call(
        _ctx_kernel,
        out_shape=jax.ShapeDtypeStruct((N, O, HWp), out_dtype),
        grid_spec=pltpu.PrefetchScalarGridSpec(
            num_scalar_prefetch=0,
            grid=(N, HWp // tile_hw),
            in_specs=in_specs,
            out_specs=pl.BlockSpec((1, O, tile_hw), lambda n, t: (n, 0, t)),
        ),
        compiler_params=pltpu.CompilerParams(
            dimension_semantics=("parallel", "parallel"),
            vmem_limit_bytes=vmem_limit,
        ),
    )


# ---------------------------------------------------------------------------
# Wrapper: mirrors ContextualModule.forward.  Input is NCHW (PyTorch layout).
# ---------------------------------------------------------------------------
def contextual_module_forward(feature, params, tile_hw=None, out_dtype=jnp.bfloat16):
    N, C, H, W = feature.shape
    O = params["bottleneck_b"].shape[0]
    HW = H * W

    phys_vmem = _vmem_capacity_bytes()
    tile, HWp = _choose_tile(HW, tile_hw, phys_vmem)
    vmem_limit = max(32 * 1024 * 1024, min(96 * 1024 * 1024, int(phys_vmem * 0.6)))

    # --- single bf16 cast of the feature, reused for pooling and the kernel ---
    feat_b = feature.astype(jnp.bfloat16)                    # (N, C, H, W)
    feat_p = feat_b.reshape(N, C, HW)
    if HWp != HW:
        feat_p = jnp.pad(feat_p, ((0, 0), (0, 0), (0, HWp - HW)))

    # --- fused adaptive row-pooling: one contraction against the feature ---
    ph_all = jnp.asarray(
        np.concatenate([_adaptive_pool_matrix(H, s) for s in SIZES], axis=0),
        dtype=jnp.bfloat16)                                   # (12, H)
    pooled_rows = jnp.einsum('ph,nchw->ncpw', ph_all, feat_b,
                             preferred_element_type=jnp.float32)  # (N, C, 12, W)

    # --- tiny per-scale grids: column pool, scale conv, weight_net fold, merge ---
    ww = params["weight_net_w"]                               # (C, C) f32
    g_merged, off = [], 0
    for idx, s in enumerate(SIZES):
        rows = pooled_rows[:, :, off:off + s, :]; off += s    # (N, C, s, W)
        pw = jnp.asarray(_adaptive_pool_matrix(W, s))         # (s, W)
        pooled = jnp.einsum('ncpw,qw->ncpq', rows, pw)        # (N, C, s, s)
        sc = jnp.einsum('oc,ncpq->nopq', params["scale_w"][idx], pooled)
        g = sc.reshape(N, C, s * s)                           # (N, C, s*s)
        gw = jnp.einsum('dc,ncq->ndq', ww, g)                 # Ww @ g
        gq = jnp.concatenate([g, gw], axis=1)                 # (N, 2C, s*s)
        gq = jnp.pad(gq, ((0, 0), (0, 0), (0, S_MAX - s * s)))
        g_merged.append(gq)
    g_m = jnp.stack(g_merged, axis=1).astype(jnp.bfloat16)    # (N, 4, 2C, 36)

    u_t = _upsample_matrices(H, W, HWp)                       # (4, 36, HWp) bf16, cached

    ww_b = ww.astype(jnp.bfloat16)
    bw = params["weight_net_b"].reshape(C, 1).astype(jnp.float32)
    wb = params["bottleneck_w"]                               # (O, 2C)
    wb1 = wb[:, :C].astype(jnp.bfloat16)                      # fused channels
    wb2 = wb[:, C:].astype(jnp.bfloat16)                      # raw feature channels
    bb = params["bottleneck_b"].reshape(O, 1).astype(jnp.float32)

    args = (feat_p, u_t, g_m, ww_b, bw, wb1, wb2, bb)
    try:
        out = _build_ctx_call(N, C, O, HWp, tile, out_dtype, vmem_limit, True)(*args)
    except Exception:
        # Fallback: retry with default double buffering if Buffered(1) is rejected.
        out = _build_ctx_call(N, C, O, HWp, tile, out_dtype, vmem_limit, False)(*args)

    if HWp != HW:                                             # usually a no-op
        out = out[:, :, :HW]
    return out.reshape(N, O, H, W)


# ---------------------------------------------------------------------------
# Pure-JAX f32 reference (mirrors the PyTorch module exactly).
# ---------------------------------------------------------------------------
def contextual_module_reference(feature, params):
    N, C, H, W = feature.shape
    ms_list = []
    for idx, s in enumerate(SIZES):
        ph = jnp.asarray(_adaptive_pool_matrix(H, s))
        pw = jnp.asarray(_adaptive_pool_matrix(W, s))
        pooled = jnp.einsum('ph,nchw,qw->ncpq', ph, feature, pw)
        sc = jnp.einsum('oc,ncpq->nopq', params["scale_w"][idx], pooled)
        lh = jnp.asarray(_bilinear_matrix(H, s))
        lw = jnp.asarray(_bilinear_matrix(W, s))
        ms_list.append(jnp.einsum('hp,ncpq,wq->nchw', lh, sc, lw))
    wnw, wnb = params["weight_net_w"], params["weight_net_b"]
    weights = []
    for ms in ms_list:
        d = feature - ms
        conv = jnp.einsum('oc,nchw->nohw', wnw, d) + wnb[None, :, None, None]
        weights.append(jax.nn.sigmoid(conv))
    num = sum(ms_list[i] * weights[i] for i in range(len(SIZES)))
    den = sum(weights) + EPS
    fused = num / den
    cat = jnp.concatenate([fused, feature], axis=1)
    out = (jnp.einsum('oc,nchw->nohw', params["bottleneck_w"], cat)
           + params["bottleneck_b"][None, :, None, None])
    return jnp.maximum(out, 0.0)


def init_params(key, in_channels, out_channels):
    C, Oc = in_channels, out_channels
    ks = jax.random.split(key, 8)
    return {
        "scale_w": jnp.stack(
            [0.1 * jax.random.normal(ks[i], (C, C), jnp.float32)
             for i in range(4)]),                             # 4 x (C, C), no bias
        "weight_net_w": 0.1 * jax.random.normal(ks[4], (C, C), jnp.float32),
        "weight_net_b": 0.1 * jax.random.normal(ks[5], (C,), jnp.float32),
        "bottleneck_w": 0.1 * jax.random.normal(ks[6], (Oc, 2 * C), jnp.float32),
        "bottleneck_b": 0.1 * jax.random.normal(ks[7], (Oc,), jnp.float32),
    }


if __name__ == "__main__":
    key = jax.random.PRNGKey(0)
    k_feat, k_par = jax.random.split(key)

    N, C, H, W = 2, 4, 16, 16          # small NCHW input, like the PyTorch module
    O = 32                             # small stand-in for out_channels=512
    feature = jax.random.normal(k_feat, (N, C, H, W), jnp.float32)
    params = init_params(k_par, C, O)

    out = contextual_module_forward(feature, params)
    out = jax.block_until_ready(out)

    ref = jax.block_until_ready(contextual_module_reference(feature, params))
    # bf16 operands / bf16 sigmoid arg / bf16 output store / approx reciprocal
    # -> relaxed tolerance vs the f32 reference.
    np.testing.assert_allclose(np.asarray(out.astype(jnp.float32)),
                               np.asarray(ref), rtol=3e-2, atol=3e-2)
    assert out.shape == (N, O, H, W)
    print("KERNEL_OK")
</pallas_src>

<mosaic_0001>
module attributes {stable_mosaic.version = 11 : i64} {
  func.func @_ctx_kernel(%arg0: i32, %arg1: i32, %arg2: memref<1x4x256xbf16, #tpu.memory_space<vmem>>, %arg3: memref<4x36x256xbf16, #tpu.memory_space<vmem>>, %arg4: memref<1x4x8x36xbf16, #tpu.memory_space<vmem>>, %arg5: memref<4x4xbf16, #tpu.memory_space<vmem>>, %arg6: memref<4x1xf32, #tpu.memory_space<vmem>>, %arg7: memref<32x4xbf16, #tpu.memory_space<vmem>>, %arg8: memref<32x4xbf16, #tpu.memory_space<vmem>>, %arg9: memref<32x1xf32, #tpu.memory_space<vmem>>, %arg10: memref<1x32x256xbf16, #tpu.memory_space<vmem>>) attributes {dimension_semantics = [#tpu.dimension_semantics<parallel>, #tpu.dimension_semantics<parallel>], iteration_bounds = array<i64: 2, 1>, scalar_prefetch = 0 : i64, scratch_operands = 0 : i64, tpu.core_type = #tpu.core_type<tc>, window_params = [{transform_indices = @transform_0, window_bounds = array<i64: 1, 4, 256>}, {transform_indices = @transform_1, window_bounds = array<i64: 4, 36, 256>}, {transform_indices = @transform_2, window_bounds = array<i64: 1, 4, 8, 36>}, {pipeline_mode = #tpu.pipeline_mode<synchronous>, transform_indices = @transform_3, window_bounds = array<i64: 4, 4>}, {pipeline_mode = #tpu.pipeline_mode<synchronous>, transform_indices = @transform_4, window_bounds = array<i64: 4, 1>}, {pipeline_mode = #tpu.pipeline_mode<synchronous>, transform_indices = @transform_5, window_bounds = array<i64: 32, 4>}, {pipeline_mode = #tpu.pipeline_mode<synchronous>, transform_indices = @transform_6, window_bounds = array<i64: 32, 4>}, {pipeline_mode = #tpu.pipeline_mode<synchronous>, transform_indices = @transform_7, window_bounds = array<i64: 32, 1>}, {transform_indices = @transform_8, window_bounds = array<i64: 1, 32, 256>}]} {
    %c0 = arith.constant 0 : index
    %c0_0 = arith.constant 0 : index
    %c0_1 = arith.constant 0 : index
    %0 = vector.load %arg2[%c0, %c0_0, %c0_1] : memref<1x4x256xbf16, #tpu.memory_space<vmem>>, vector<1x4x256xbf16>
    %1 = vector.shape_cast %0 : vector<1x4x256xbf16> to vector<4x256xbf16>
    %c0_2 = arith.constant 0 : index
    %c0_3 = arith.constant 0 : index
    %2 = vector.load %arg5[%c0_2, %c0_3] : memref<4x4xbf16, #tpu.memory_space<vmem>>, vector<4x4xbf16>
    %cst = arith.constant dense<0.000000e+00> : vector<4x256xf32>
    %3 = tpu.matmul %2, %1, %cst {dimension_numbers = #tpu.dot_dimension_numbers<[1], [0], [0], [1], [0, 0, 1, 1], [], []>} : vector<4x4xbf16>, vector<4x256xbf16>, vector<4x256xf32> -> vector<4x256xf32>
    %c0_4 = arith.constant 0 : index
    %c0_5 = arith.constant 0 : index
    %4 = vector.load %arg6[%c0_4, %c0_5] : memref<4x1xf32, #tpu.memory_space<vmem>>, vector<4x1xf32>
    %5 = vector.broadcast %4 : vector<4x1xf32> to vector<4x256xf32>
    %6 = arith.addf %3, %5 : vector<4x256xf32>
    %cst_6 = arith.constant 0.000000e+00 : f32
    %7 = vector.broadcast %cst_6 : f32 to vector<4x256xf32>
    %cst_7 = arith.constant 0.000000e+00 : f32
    %8 = vector.broadcast %cst_7 : f32 to vector<4x256xf32>
    %c0_8 = arith.constant 0 : index
    %c0_9 = arith.constant 0 : index
    %c0_10 = arith.constant 0 : index
    %9 = vector.load %arg3[%c0_8, %c0_9, %c0_10] : memref<4x36x256xbf16, #tpu.memory_space<vmem>>, vector<1x36x256xbf16>
    %10 = vector.shape_cast %9 : vector<1x36x256xbf16> to vector<36x256xbf16>
    %c0_11 = arith.constant 0 : index
    %c0_12 = arith.constant 0 : index
    %c0_13 = arith.constant 0 : index
    %c0_14 = arith.constant 0 : index
    %11 = vector.load %arg4[%c0_11, %c0_12, %c0_13, %c0_14] : memref<1x4x8x36xbf16, #tpu.memory_space<vmem>>, vector<1x1x8x36xbf16>
    %12 = vector.shape_cast %11 : vector<1x1x8x36xbf16> to vector<8x36xbf16>
    %cst_15 = arith.constant dense<0.000000e+00> : vector<8x256xf32>
    %13 = tpu.matmul %12, %10, %cst_15 {dimension_numbers = #tpu.dot_dimension_numbers<[1], [0], [0], [1], [0, 0, 1, 1], [], []>} : vector<8x36xbf16>, vector<36x256xbf16>, vector<8x256xf32> -> vector<8x256xf32>
    %14 = vector.extract_strided_slice %13 {offsets = [0, 0], sizes = [4, 256], strides = [1, 1]} : vector<8x256xf32> to vector<4x256xf32>
    %15 = vector.extract_strided_slice %13 {offsets = [4, 0], sizes = [4, 256], strides = [1, 1]} : vector<8x256xf32> to vector<4x256xf32>
    %16 = arith.subf %6, %15 : vector<4x256xf32>
    %17 = arith.truncf %16 : vector<4x256xf32> to vector<4x256xbf16>
    %18 = arith.negf %17 : vector<4x256xbf16>
    %19 = math.exp %18 : vector<4x256xbf16>
    %cst_16 = arith.constant 1.000000e+00 : bf16
    %20 = vector.broadcast %cst_16 : bf16 to vector<4x256xbf16>
    %21 = arith.addf %20, %19 : vector<4x256xbf16>
    %22 = arith.divf %20, %21 : vector<4x256xbf16>
    %23 = arith.extf %22 : vector<4x256xbf16> to vector<4x256xf32>
    %24 = arith.mulf %14, %23 : vector<4x256xf32>
    %25 = arith.addf %7, %24 : vector<4x256xf32>
    %26 = arith.extf %22 : vector<4x256xbf16> to vector<4x256xf32>
    %27 = arith.addf %8, %26 : vector<4x256xf32>
    %c1 = arith.constant 1 : index
    %c0_17 = arith.constant 0 : index
    %c0_18 = arith.constant 0 : index
    %28 = vector.load %arg3[%c1, %c0_17, %c0_18] : memref<4x36x256xbf16, #tpu.memory_space<vmem>>, vector<1x36x256xbf16>
    %29 = vector.shape_cast %28 : vector<1x36x256xbf16> to vector<36x256xbf16>
    %c0_19 = arith.constant 0 : index
    %c1_20 = arith.constant 1 : index
    %c0_21 = arith.constant 0 : index
    %c0_22 = arith.constant 0 : index
    %30 = vector.load %arg4[%c0_19, %c1_20, %c0_21, %c0_22] : memref<1x4x8x36xbf16, #tpu.memory_space<vmem>>, vector<1x1x8x36xbf16>
    %31 = vector.shape_cast %30 : vector<1x1x8x36xbf16> to vector<8x36xbf16>
    %cst_23 = arith.constant dense<0.000000e+00> : vector<8x256xf32>
    %32 = tpu.matmul %31, %29, %cst_23 {dimension_numbers = #tpu.dot_dimension_numbers<[1], [0], [0], [1], [0, 0, 1, 1], [], []>} : vector<8x36xbf16>, vector<36x256xbf16>, vector<8x256xf32> -> vector<8x256xf32>
    %33 = vector.extract_strided_slice %32 {offsets = [0, 0], sizes = [4, 256], strides = [1, 1]} : vector<8x256xf32> to vector<4x256xf32>
    %34 = vector.extract_strided_slice %32 {offsets = [4, 0], sizes = [4, 256], strides = [1, 1]} : vector<8x256xf32> to vector<4x256xf32>
    %35 = arith.subf %6, %34 : vector<4x256xf32>
    %36 = arith.truncf %35 : vector<4x256xf32> to vector<4x256xbf16>
    %37 = arith.negf %36 : vector<4x256xbf16>
    %38 = math.exp %37 : vector<4x256xbf16>
    %cst_24 = arith.constant 1.000000e+00 : bf16
    %39 = vector.broadcast %cst_24 : bf16 to vector<4x256xbf16>
    %40 = arith.addf %39, %38 : vector<4x256xbf16>
    %41 = arith.divf %39, %40 : vector<4x256xbf16>
    %42 = arith.extf %41 : vector<4x256xbf16> to vector<4x256xf32>
    %43 = arith.mulf %33, %42 : vector<4x256xf32>
    %44 = arith.addf %25, %43 : vector<4x256xf32>
    %45 = arith.extf %41 : vector<4x256xbf16> to vector<4x256xf32>
    %46 = arith.addf %27, %45 : vector<4x256xf32>
    %c2 = arith.constant 2 : index
    %c0_25 = arith.constant 0 : index
    %c0_26 = arith.constant 0 : index
    %47 = vector.load %arg3[%c2, %c0_25, %c0_26] : memref<4x36x256xbf16, #tpu.memory_space<vmem>>, vector<1x36x256xbf16>
    %48 = vector.shape_cast %47 : vector<1x36x256xbf16> to vector<36x256xbf16>
    %c0_27 = arith.constant 0 : index
    %c2_28 = arith.constant 2 : index
    %c0_29 = arith.constant 0 : index
    %c0_30 = arith.constant 0 : index
    %49 = vector.load %arg4[%c0_27, %c2_28, %c0_29, %c0_30] : memref<1x4x8x36xbf16, #tpu.memory_space<vmem>>, vector<1x1x8x36xbf16>
    %50 = vector.shape_cast %49 : vector<1x1x8x36xbf16> to vector<8x36xbf16>
    %cst_31 = arith.constant dense<0.000000e+00> : vector<8x256xf32>
    %51 = tpu.matmul %50, %48, %cst_31 {dimension_numbers = #tpu.dot_dimension_numbers<[1], [0], [0], [1], [0, 0, 1, 1], [], []>} : vector<8x36xbf16>, vector<36x256xbf16>, vector<8x256xf32> -> vector<8x256xf32>
    %52 = vector.extract_strided_slice %51 {offsets = [0, 0], sizes = [4, 256], strides = [1, 1]} : vector<8x256xf32> to vector<4x256xf32>
    %53 = vector.extract_strided_slice %51 {offsets = [4, 0], sizes = [4, 256], strides = [1, 1]} : vector<8x256xf32> to vector<4x256xf32>
    %54 = arith.subf %6, %53 : vector<4x256xf32>
    %55 = arith.truncf %54 : vector<4x256xf32> to vector<4x256xbf16>
    %56 = arith.negf %55 : vector<4x256xbf16>
    %57 = math.exp %56 : vector<4x256xbf16>
    %cst_32 = arith.constant 1.000000e+00 : bf16
    %58 = vector.broadcast %cst_32 : bf16 to vector<4x256xbf16>
    %59 = arith.addf %58, %57 : vector<4x256xbf16>
    %60 = arith.divf %58, %59 : vector<4x256xbf16>
    %61 = arith.extf %60 : vector<4x256xbf16> to vector<4x256xf32>
    %62 = arith.mulf %52, %61 : vector<4x256xf32>
    %63 = arith.addf %44, %62 : vector<4x256xf32>
    %64 = arith.extf %60 : vector<4x256xbf16> to vector<4x256xf32>
    %65 = arith.addf %46, %64 : vector<4x256xf32>
    %c3 = arith.constant 3 : index
    %c0_33 = arith.constant 0 : index
    %c0_34 = arith.constant 0 : index
    %66 = vector.load %arg3[%c3, %c0_33, %c0_34] : memref<4x36x256xbf16, #tpu.memory_space<vmem>>, vector<1x36x256xbf16>
    %67 = vector.shape_cast %66 : vector<1x36x256xbf16> to vector<36x256xbf16>
    %c0_35 = arith.constant 0 : index
    %c3_36 = arith.constant 3 : index
    %c0_37 = arith.constant 0 : index
    %c0_38 = arith.constant 0 : index
    %68 = vector.load %arg4[%c0_35, %c3_36, %c0_37, %c0_38] : memref<1x4x8x36xbf16, #tpu.memory_space<vmem>>, vector<1x1x8x36xbf16>
    %69 = vector.shape_cast %68 : vector<1x1x8x36xbf16> to vector<8x36xbf16>
    %cst_39 = arith.constant dense<0.000000e+00> : vector<8x256xf32>
    %70 = tpu.matmul %69, %67, %cst_39 {dimension_numbers = #tpu.dot_dimension_numbers<[1], [0], [0], [1], [0, 0, 1, 1], [], []>} : vector<8x36xbf16>, vector<36x256xbf16>, vector<8x256xf32> -> vector<8x256xf32>
    %71 = vector.extract_strided_slice %70 {offsets = [0, 0], sizes = [4, 256], strides = [1, 1]} : vector<8x256xf32> to vector<4x256xf32>
    %72 = vector.extract_strided_slice %70 {offsets = [4, 0], sizes = [4, 256], strides = [1, 1]} : vector<8x256xf32> to vector<4x256xf32>
    %73 = arith.subf %6, %72 : vector<4x256xf32>
    %74 = arith.truncf %73 : vector<4x256xf32> to vector<4x256xbf16>
    %75 = arith.negf %74 : vector<4x256xbf16>
    %76 = math.exp %75 : vector<4x256xbf16>
    %cst_40 = arith.constant 1.000000e+00 : bf16
    %77 = vector.broadcast %cst_40 : bf16 to vector<4x256xbf16>
    %78 = arith.addf %77, %76 : vector<4x256xbf16>
    %79 = arith.divf %77, %78 : vector<4x256xbf16>
    %80 = arith.extf %79 : vector<4x256xbf16> to vector<4x256xf32>
    %81 = arith.mulf %71, %80 : vector<4x256xf32>
    %82 = arith.addf %63, %81 : vector<4x256xf32>
    %83 = arith.extf %79 : vector<4x256xbf16> to vector<4x256xf32>
    %84 = arith.addf %65, %83 : vector<4x256xf32>
    %cst_41 = arith.constant 9.99999997E-7 : f32
    %85 = vector.broadcast %cst_41 : f32 to vector<4x256xf32>
    %86 = arith.addf %84, %85 : vector<4x256xf32>
    %87 = tpu.reciprocal %86 {approx = true} : vector<4x256xf32> -> vector<4x256xf32>
    %88 = arith.mulf %82, %87 : vector<4x256xf32>
    %c0_42 = arith.constant 0 : index
    %c0_43 = arith.constant 0 : index
    %89 = vector.load %arg7[%c0_42, %c0_43] : memref<32x4xbf16, #tpu.memory_space<vmem>>, vector<32x4xbf16>
    %90 = arith.truncf %88 : vector<4x256xf32> to vector<4x256xbf16>
    %cst_44 = arith.constant dense<0.000000e+00> : vector<32x256xf32>
    %91 = tpu.matmul %89, %90, %cst_44 {dimension_numbers = #tpu.dot_dimension_numbers<[1], [0], [0], [1], [0, 0, 1, 1], [], []>} : vector<32x4xbf16>, vector<4x256xbf16>, vector<32x256xf32> -> vector<32x256xf32>
    %c0_45 = arith.constant 0 : index
    %c0_46 = arith.constant 0 : index
    %92 = vector.load %arg8[%c0_45, %c0_46] : memref<32x4xbf16, #tpu.memory_space<vmem>>, vector<32x4xbf16>
    %cst_47 = arith.constant dense<0.000000e+00> : vector<32x256xf32>
    %93 = tpu.matmul %92, %1, %cst_47 {dimension_numbers = #tpu.dot_dimension_numbers<[1], [0], [0], [1], [0, 0, 1, 1], [], []>} : vector<32x4xbf16>, vector<4x256xbf16>, vector<32x256xf32> -> vector<32x256xf32>
    %94 = arith.addf %91, %93 : vector<32x256xf32>
    %c0_48 = arith.constant 0 : index
    %c0_49 = arith.constant 0 : index
    %95 = vector.load %arg9[%c0_48, %c0_49] : memref<32x1xf32, #tpu.memory_space<vmem>>, vector<32x1xf32>
    %96 = vector.broadcast %95 : vector<32x1xf32> to vector<32x256xf32>
    %97 = arith.addf %94, %96 : vector<32x256xf32>
    %cst_50 = arith.constant 0.000000e+00 : f32
    %98 = vector.broadcast %cst_50 : f32 to vector<32x256xf32>
    %99 = arith.maximumf %97, %98 : vector<32x256xf32>
    %100 = arith.truncf %99 : vector<32x256xf32> to vector<32x256xbf16>
    %c0_51 = arith.constant 0 : index
    %c0_52 = arith.constant 0 : index
    %c0_53 = arith.constant 0 : index
    %101 = vector.load %arg10[%c0_51, %c0_52, %c0_53] : memref<1x32x256xbf16, #tpu.memory_space<vmem>>, vector<1x32x256xbf16>
    %102 = vector.shape_cast %101 : vector<1x32x256xbf16> to vector<32x256xbf16>
    %103 = vector.shape_cast %100 : vector<32x256xbf16> to vector<1x32x256xbf16>
    tpu.vector_store %arg10[%c0_51, %c0_52, %c0_53], %103 {strides = array<i32>} : memref<1x32x256xbf16, #tpu.memory_space<vmem>>, vector<1x32x256xbf16>,
    return
  }
  func.func @transform_0(%arg0: i32, %arg1: i32) -> (i32, i32, i32) {
    %c0_i32 = arith.constant 0 : i32
    %c0_i32_0 = arith.constant 0 : i32
    return %arg0, %c0_i32, %arg1 : i32, i32, i32
  }
  func.func @transform_1(%arg0: i32, %arg1: i32) -> (i32, i32, i32) {
    %c0_i32 = arith.constant 0 : i32
    %c0_i32_0 = arith.constant 0 : i32
    %c0_i32_1 = arith.constant 0 : i32
    return %c0_i32, %c0_i32_0, %arg1 : i32, i32, i32
  }
  func.func @transform_2(%arg0: i32, %arg1: i32) -> (i32, i32, i32, i32) {
    %c0_i32 = arith.constant 0 : i32
    %c0_i32_0 = arith.constant 0 : i32
    %c0_i32_1 = arith.constant 0 : i32
    %c0_i32_2 = arith.constant 0 : i32
    return %arg0, %c0_i32, %c0_i32_0, %c0_i32_1 : i32, i32, i32, i32
  }
  func.func @transform_3(%arg0: i32, %arg1: i32) -> (i32, i32) {
    %c0_i32 = arith.constant 0 : i32
    %c0_i32_0 = arith.constant 0 : i32
    %c0_i32_1 = arith.constant 0 : i32
    return %c0_i32, %c0_i32_0 : i32, i32
  }
  func.func @transform_4(%arg0: i32, %arg1: i32) -> (i32, i32) {
    %c0_i32 = arith.constant 0 : i32
    %c0_i32_0 = arith.constant 0 : i32
    %c0_i32_1 = arith.constant 0 : i32
    return %c0_i32, %c0_i32_0 : i32, i32
  }
  func.func @transform_5(%arg0: i32, %arg1: i32) -> (i32, i32) {
    %c0_i32 = arith.constant 0 : i32
    %c0_i32_0 = arith.constant 0 : i32
    %c0_i32_1 = arith.constant 0 : i32
    return %c0_i32, %c0_i32_0 : i32, i32
  }
  func.func @transform_6(%arg0: i32, %arg1: i32) -> (i32, i32) {
    %c0_i32 = arith.constant 0 : i32
    %c0_i32_0 = arith.constant 0 : i32
    %c0_i32_1 = arith.constant 0 : i32
    return %c0_i32, %c0_i32_0 : i32, i32
  }
  func.func @transform_7(%arg0: i32, %arg1: i32) -> (i32, i32) {
    %c0_i32 = arith.constant 0 : i32
    %c0_i32_0 = arith.constant 0 : i32
    %c0_i32_1 = arith.constant 0 : i32
    return %c0_i32, %c0_i32_0 : i32, i32
  }
  func.func @transform_8(%arg0: i32, %arg1: i32) -> (i32, i32, i32) {
    %c0_i32 = arith.constant 0 : i32
    %c0_i32_0 = arith.constant 0 : i32
    return %arg0, %c0_i32, %arg1 : i32, i32, i32
  }
}

module attributes {stable_mosaic.version = 11 : i64} {
  func.func @_ctx_kernel(%arg0: i32, %arg1: i32, %arg2: memref<1x4x256xbf16, #tpu.memory_space<vmem>>, %arg3: memref<4x36x256xbf16, #tpu.memory_space<vmem>>, %arg4: memref<1x4x8x36xbf16, #tpu.memory_space<vmem>>, %arg5: memref<4x4xbf16, #tpu.memory_space<vmem>>, %arg6: memref<4x1xf32, #tpu.memory_space<vmem>>, %arg7: memref<32x4xbf16, #tpu.memory_space<vmem>>, %arg8: memref<32x4xbf16, #tpu.memory_space<vmem>>, %arg9: memref<32x1xf32, #tpu.memory_space<vmem>>, %arg10: memref<1x32x256xbf16, #tpu.memory_space<vmem>>) attributes {dimension_semantics = [#tpu.dimension_semantics<parallel>, #tpu.dimension_semantics<parallel>], iteration_bounds = array<i64: 2, 1>, scalar_prefetch = 0 : i64, scratch_operands = 0 : i64, tpu.core_type = #tpu.core_type<tc>, window_params = [{transform_indices = @transform_0, window_bounds = array<i64: 1, 4, 256>}, {transform_indices = @transform_1, window_bounds = array<i64: 4, 36, 256>}, {transform_indices = @transform_2, window_bounds = array<i64: 1, 4, 8, 36>}, {pipeline_mode = #tpu.pipeline_mode<synchronous>, transform_indices = @transform_3, window_bounds = array<i64: 4, 4>}, {pipeline_mode = #tpu.pipeline_mode<synchronous>, transform_indices = @transform_4, window_bounds = array<i64: 4, 1>}, {pipeline_mode = #tpu.pipeline_mode<synchronous>, transform_indices = @transform_5, window_bounds = array<i64: 32, 4>}, {pipeline_mode = #tpu.pipeline_mode<synchronous>, transform_indices = @transform_6, window_bounds = array<i64: 32, 4>}, {pipeline_mode = #tpu.pipeline_mode<synchronous>, transform_indices = @transform_7, window_bounds = array<i64: 32, 1>}, {transform_indices = @transform_8, window_bounds = array<i64: 1, 32, 256>}]} {
    %c0 = arith.constant 0 : index
    %c0_0 = arith.constant 0 : index
    %c0_1 = arith.constant 0 : index
    %0 = vector.load %arg2[%c0, %c0_0, %c0_1] : memref<1x4x256xbf16, #tpu.memory_space<vmem>>, vector<1x4x256xbf16>
    %1 = vector.shape_cast %0 : vector<1x4x256xbf16> to vector<4x256xbf16>
    %c0_2 = arith.constant 0 : index
    %c0_3 = arith.constant 0 : index
    %2 = vector.load %arg5[%c0_2, %c0_3] : memref<4x4xbf16, #tpu.memory_space<vmem>>, vector<4x4xbf16>
    %cst = arith.constant dense<0.000000e+00> : vector<4x256xf32>
    %3 = tpu.matmul %2, %1, %cst {dimension_numbers = #tpu.dot_dimension_numbers<[1], [0], [0], [1], [0, 0, 1, 1], [], []>} : vector<4x4xbf16>, vector<4x256xbf16>, vector<4x256xf32> -> vector<4x256xf32>
    %c0_4 = arith.constant 0 : index
    %c0_5 = arith.constant 0 : index
    %4 = vector.load %arg6[%c0_4, %c0_5] : memref<4x1xf32, #tpu.memory_space<vmem>>, vector<4x1xf32>
    %5 = vector.broadcast %4 : vector<4x1xf32> to vector<4x256xf32>
    %6 = arith.addf %3, %5 : vector<4x256xf32>
    %cst_6 = arith.constant 0.000000e+00 : f32
    %7 = vector.broadcast %cst_6 : f32 to vector<4x256xf32>
    %cst_7 = arith.constant 0.000000e+00 : f32
    %8 = vector.broadcast %cst_7 : f32 to vector<4x256xf32>
    %c0_8 = arith.constant 0 : index
    %c0_9 = arith.constant 0 : index
    %c0_10 = arith.constant 0 : index
    %9 = vector.load %arg3[%c0_8, %c0_9, %c0_10] : memref<4x36x256xbf16, #tpu.memory_space<vmem>>, vector<1x36x256xbf16>
    %10 = vector.shape_cast %9 : vector<1x36x256xbf16> to vector<36x256xbf16>
    %c0_11 = arith.constant 0 : index
    %c0_12 = arith.constant 0 : index
    %c0_13 = arith.constant 0 : index
    %c0_14 = arith.constant 0 : index
    %11 = vector.load %arg4[%c0_11, %c0_12, %c0_13, %c0_14] : memref<1x4x8x36xbf16, #tpu.memory_space<vmem>>, vector<1x1x8x36xbf16>
    %12 = vector.shape_cast %11 : vector<1x1x8x36xbf16> to vector<8x36xbf16>
    %cst_15 = arith.constant dense<0.000000e+00> : vector<8x256xf32>
    %13 = tpu.matmul %12, %10, %cst_15 {dimension_numbers = #tpu.dot_dimension_numbers<[1], [0], [0], [1], [0, 0, 1, 1], [], []>} : vector<8x36xbf16>, vector<36x256xbf16>, vector<8x256xf32> -> vector<8x256xf32>
    %14 = vector.extract_strided_slice %13 {offsets = [0, 0], sizes = [4, 256], strides = [1, 1]} : vector<8x256xf32> to vector<4x256xf32>
    %15 = vector.extract_strided_slice %13 {offsets = [4, 0], sizes = [4, 256], strides = [1, 1]} : vector<8x256xf32> to vector<4x256xf32>
    %16 = arith.subf %6, %15 : vector<4x256xf32>
    %17 = arith.truncf %16 : vector<4x256xf32> to vector<4x256xbf16>
    %18 = arith.negf %17 : vector<4x256xbf16>
    %19 = math.exp %18 : vector<4x256xbf16>
    %cst_16 = arith.constant 1.000000e+00 : bf16
    %20 = vector.broadcast %cst_16 : bf16 to vector<4x256xbf16>
    %21 = arith.addf %20, %19 : vector<4x256xbf16>
    %22 = arith.divf %20, %21 : vector<4x256xbf16>
    %23 = arith.extf %22 : vector<4x256xbf16> to vector<4x256xf32>
    %24 = arith.mulf %14, %23 : vector<4x256xf32>
    %25 = arith.addf %7, %24 : vector<4x256xf32>
    %26 = arith.extf %22 : vector<4x256xbf16> to vector<4x256xf32>
    %27 = arith.addf %8, %26 : vector<4x256xf32>
    %c1 = arith.constant 1 : index
    %c0_17 = arith.constant 0 : index
    %c0_18 = arith.constant 0 : index
    %28 = vector.load %arg3[%c1, %c0_17, %c0_18] : memref<4x36x256xbf16, #tpu.memory_space<vmem>>, vector<1x36x256xbf16>
    %29 = vector.shape_cast %28 : vector<1x36x256xbf16> to vector<36x256xbf16>
    %c0_19 = arith.constant 0 : index
    %c1_20 = arith.constant 1 : index
    %c0_21 = arith.constant 0 : index
    %c0_22 = arith.constant 0 : index
    %30 = vector.load %arg4[%c0_19, %c1_20, %c0_21, %c0_22] : memref<1x4x8x36xbf16, #tpu.memory_space<vmem>>, vector<1x1x8x36xbf16>
    %31 = vector.shape_cast %30 : vector<1x1x8x36xbf16> to vector<8x36xbf16>
    %cst_23 = arith.constant dense<0.000000e+00> : vector<8x256xf32>
    %32 = tpu.matmul %31, %29, %cst_23 {dimension_numbers = #tpu.dot_dimension_numbers<[1], [0], [0], [1], [0, 0, 1, 1], [], []>} : vector<8x36xbf16>, vector<36x256xbf16>, vector<8x256xf32> -> vector<8x256xf32>
    %33 = vector.extract_strided_slice %32 {offsets = [0, 0], sizes = [4, 256], strides = [1, 1]} : vector<8x256xf32> to vector<4x256xf32>
    %34 = vector.extract_strided_slice %32 {offsets = [4, 0], sizes = [4, 256], strides = [1, 1]} : vector<8x256xf32> to vector<4x256xf32>
    %35 = arith.subf %6, %34 : vector<4x256xf32>
    %36 = arith.truncf %35 : vector<4x256xf32> to vector<4x256xbf16>
    %37 = arith.negf %36 : vector<4x256xbf16>
    %38 = math.exp %37 : vector<4x256xbf16>
    %cst_24 = arith.constant 1.000000e+00 : bf16
    %39 = vector.broadcast %cst_24 : bf16 to vector<4x256xbf16>
    %40 = arith.addf %39, %38 : vector<4x256xbf16>
    %41 = arith.divf %39, %40 : vector<4x256xbf16>
    %42 = arith.extf %41 : vector<4x256xbf16> to vector<4x256xf32>
    %43 = arith.mulf %33, %42 : vector<4x256xf32>
    %44 = arith.addf %25, %43 : vector<4x256xf32>
    %45 = arith.extf %41 : vector<4x256xbf16> to vector<4x256xf32>
    %46 = arith.addf %27, %45 : vector<4x256xf32>
    %c2 = arith.constant 2 : index
    %c0_25 = arith.constant 0 : index
    %c0_26 = arith.constant 0 : index
    %47 = vector.load %arg3[%c2, %c0_25, %c0_26] : memref<4x36x256xbf16, #tpu.memory_space<vmem>>, vector<1x36x256xbf16>
    %48 = vector.shape_cast %47 : vector<1x36x256xbf16> to vector<36x256xbf16>
    %c0_27 = arith.constant 0 : index
    %c2_28 = arith.constant 2 : index
    %c0_29 = arith.constant 0 : index
    %c0_30 = arith.constant 0 : index
    %49 = vector.load %arg4[%c0_27, %c2_28, %c0_29, %c0_30] : memref<1x4x8x36xbf16, #tpu.memory_space<vmem>>, vector<1x1x8x36xbf16>
    %50 = vector.shape_cast %49 : vector<1x1x8x36xbf16> to vector<8x36xbf16>
    %cst_31 = arith.constant dense<0.000000e+00> : vector<8x256xf32>
    %51 = tpu.matmul %50, %48, %cst_31 {dimension_numbers = #tpu.dot_dimension_numbers<[1], [0], [0], [1], [0, 0, 1, 1], [], []>} : vector<8x36xbf16>, vector<36x256xbf16>, vector<8x256xf32> -> vector<8x256xf32>
    %52 = vector.extract_strided_slice %51 {offsets = [0, 0], sizes = [4, 256], strides = [1, 1]} : vector<8x256xf32> to vector<4x256xf32>
    %53 = vector.extract_strided_slice %51 {offsets = [4, 0], sizes = [4, 256], strides = [1, 1]} : vector<8x256xf32> to vector<4x256xf32>
    %54 = arith.subf %6, %53 : vector<4x256xf32>
    %55 = arith.truncf %54 : vector<4x256xf32> to vector<4x256xbf16>
    %56 = arith.negf %55 : vector<4x256xbf16>
    %57 = math.exp %56 : vector<4x256xbf16>
    %cst_32 = arith.constant 1.000000e+00 : bf16
    %58 = vector.broadcast %cst_32 : bf16 to vector<4x256xbf16>
    %59 = arith.addf %58, %57 : vector<4x256xbf16>
    %60 = arith.divf %58, %59 : vector<4x256xbf16>
    %61 = arith.extf %60 : vector<4x256xbf16> to vector<4x256xf32>
    %62 = arith.mulf %52, %61 : vector<4x256xf32>
    %63 = arith.addf %44, %62 : vector<4x256xf32>
    %64 = arith.extf %60 : vector<4x256xbf16> to vector<4x256xf32>
    %65 = arith.addf %46, %64 : vector<4x256xf32>
    %c3 = arith.constant 3 : index
    %c0_33 = arith.constant 0 : index
    %c0_34 = arith.constant 0 : index
    %66 = vector.load %arg3[%c3, %c0_33, %c0_34] : memref<4x36x256xbf16, #tpu.memory_space<vmem>>, vector<1x36x256xbf16>
    %67 = vector.shape_cast %66 : vector<1x36x256xbf16> to vector<36x256xbf16>
    %c0_35 = arith.constant 0 : index
    %c3_36 = arith.constant 3 : index
    %c0_37 = arith.constant 0 : index
    %c0_38 = arith.constant 0 : index
    %68 = vector.load %arg4[%c0_35, %c3_36, %c0_37, %c0_38] : memref<1x4x8x36xbf16, #tpu.memory_space<vmem>>, vector<1x1x8x36xbf16>
    %69 = vector.shape_cast %68 : vector<1x1x8x36xbf16> to vector<8x36xbf16>
    %cst_39 = arith.constant dense<0.000000e+00> : vector<8x256xf32>
    %70 = tpu.matmul %69, %67, %cst_39 {dimension_numbers = #tpu.dot_dimension_numbers<[1], [0], [0], [1], [0, 0, 1, 1], [], []>} : vector<8x36xbf16>, vector<36x256xbf16>, vector<8x256xf32> -> vector<8x256xf32>
    %71 = vector.extract_strided_slice %70 {offsets = [0, 0], sizes = [4, 256], strides = [1, 1]} : vector<8x256xf32> to vector<4x256xf32>
    %72 = vector.extract_strided_slice %70 {offsets = [4, 0], sizes = [4, 256], strides = [1, 1]} : vector<8x256xf32> to vector<4x256xf32>
    %73 = arith.subf %6, %72 : vector<4x256xf32>
    %74 = arith.truncf %73 : vector<4x256xf32> to vector<4x256xbf16>
    %75 = arith.negf %74 : vector<4x256xbf16>
    %76 = math.exp %75 : vector<4x256xbf16>
    %cst_40 = arith.constant 1.000000e+00 : bf16
    %77 = vector.broadcast %cst_40 : bf16 to vector<4x256xbf16>
    %78 = arith.addf %77, %76 : vector<4x256xbf16>
    %79 = arith.divf %77, %78 : vector<4x256xbf16>
    %80 = arith.extf %79 : vector<4x256xbf16> to vector<4x256xf32>
    %81 = arith.mulf %71, %80 : vector<4x256xf32>
    %82 = arith.addf %63, %81 : vector<4x256xf32>
    %83 = arith.extf %79 : vector<4x256xbf16> to vector<4x256xf32>
    %84 = arith.addf %65, %83 : vector<4x256xf32>
    %cst_41 = arith.constant 9.99999997E-7 : f32
    %85 = vector.broadcast %cst_41 : f32 to vector<4x256xf32>
    %86 = arith.addf %84, %85 : vector<4x256xf32>
    %87 = tpu.reciprocal %86 {approx = true} : vector<4x256xf32> -> vector<4x256xf32>
    %88 = arith.mulf %82, %87 : vector<4x256xf32>
    %c0_42 = arith.constant 0 : index
    %c0_43 = arith.constant 0 : index
    %89 = vector.load %arg7[%c0_42, %c0_43] : memref<32x4xbf16, #tpu.memory_space<vmem>>, vector<32x4xbf16>
    %90 = arith.truncf %88 : vector<4x256xf32> to vector<4x256xbf16>
    %cst_44 = arith.constant dense<0.000000e+00> : vector<32x256xf32>
    %91 = tpu.matmul %89, %90, %cst_44 {dimension_numbers = #tpu.dot_dimension_numbers<[1], [0], [0], [1], [0, 0, 1, 1], [], []>} : vector<32x4xbf16>, vector<4x256xbf16>, vector<32x256xf32> -> vector<32x256xf32>
    %c0_45 = arith.constant 0 : index
    %c0_46 = arith.constant 0 : index
    %92 = vector.load %arg8[%c0_45, %c0_46] : memref<32x4xbf16, #tpu.memory_space<vmem>>, vector<32x4xbf16>
    %cst_47 = arith.constant dense<0.000000e+00> : vector<32x256xf32>
    %93 = tpu.matmul %92, %1, %cst_47 {dimension_numbers = #tpu.dot_dimension_numbers<[1], [0], [0], [1], [0, 0, 1, 1], [], []>} : vector<32x4xbf16>, vector<4x256xbf16>, vector<32x256xf32> -> vector<32x256xf32>
    %94 = arith.addf %91, %93 : vector<32x256xf32>
    %c0_48 = arith.constant 0 : index
    %c0_49 = arith.constant 0 : index
    %95 = vector.load %arg9[%c0_48, %c0_49] : memref<32x1xf32, #tpu.memory_space<vmem>>, vector<32x1xf32>
    %96 = vector.broadcast %95 : vector<32x1xf32> to vector<32x256xf32>
    %97 = arith.addf %94, %96 : vector<32x256xf32>
    %cst_50 = arith.constant 0.000000e+00 : f32
    %98 = vector.broadcast %cst_50 : f32 to vector<32x256xf32>
    %99 = arith.maximumf %97, %98 : vector<32x256xf32>
    %100 = arith.truncf %99 : vector<32x256xf32> to vector<32x256xbf16>
    %c0_51 = arith.constant 0 : index
    %c0_52 = arith.constant 0 : index
    %c0_53 = arith.constant 0 : index
    %101 = vector.load %arg10[%c0_51, %c0_52, %c0_53] : memref<1x32x256xbf16, #tpu.memory_space<vmem>>, vector<1x32x256xbf16>
    %102 = vector.shape_cast %101 : vector<1x32x256xbf16> to vector<32x256xbf16>
    %103 = vector.shape_cast %100 : vector<32x256xbf16> to vector<1x32x256xbf16>
    tpu.vector_store %arg10[%c0_51, %c0_52, %c0_53], %103 {strides = array<i32>} : memref<1x32x256xbf16, #tpu.memory_space<vmem>>, vector<1x32x256xbf16>,
    return
  }
  func.func @transform_0(%arg0: i32, %arg1: i32) -> (i32, i32, i32) {
    %c0_i32 = arith.constant 0 : i32
    %c0_i32_0 = arith.constant 0 : i32
    return %arg0, %c0_i32, %arg1 : i32, i32, i32
  }
  func.func @transform_1(%arg0: i32, %arg1: i32) -> (i32, i32, i32) {
    %c0_i32 = arith.constant 0 : i32
    %c0_i32_0 = arith.constant 0 : i32
    %c0_i32_1 = arith.constant 0 : i32
    return %c0_i32, %c0_i32_0, %arg1 : i32, i32, i32
  }
  func.func @transform_2(%arg0: i32, %arg1: i32) -> (i32, i32, i32, i32) {
    %c0_i32 = arith.constant 0 : i32
    %c0_i32_0 = arith.constant 0 : i32
    %c0_i32_1 = arith.constant 0 : i32
    %c0_i32_2 = arith.constant 0 : i32
    return %arg0, %c0_i32, %c0_i32_0, %c0_i32_1 : i32, i32, i32, i32
  }
  func.func @transform_3(%arg0: i32, %arg1: i32) -> (i32, i32) {
    %c0_i32 = arith.constant 0 : i32
    %c0_i32_0 = arith.constant 0 : i32
    %c0_i32_1 = arith.constant 0 : i32
    return %c0_i32, %c0_i32_0 : i32, i32
  }
  func.func @transform_4(%arg0: i32, %arg1: i32) -> (i32, i32) {
    %c0_i32 = arith.constant 0 : i32
    %c0_i32_0 = arith.constant 0 : i32
    %c0_i32_1 = arith.constant 0 : i32
    return %c0_i32, %c0_i32_0 : i32, i32
  }
  func.func @transform_5(%arg0: i32, %arg1: i32) -> (i32, i32) {
    %c0_i32 = arith.constant 0 : i32
    %c0_i32_0 = arith.constant 0 : i32
    %c0_i32_1 = arith.constant 0 : i32
    return %c0_i32, %c0_i32_0 : i32, i32
  }
  func.func @transform_6(%arg0: i32, %arg1: i32) -> (i32, i32) {
    %c0_i32 = arith.constant 0 : i32
    %c0_i32_0 = arith.constant 0 : i32
    %c0_i32_1 = arith.constant 0 : i32
    return %c0_i32, %c0_i32_0 : i32, i32
  }
  func.func @transform_7(%arg0: i32, %arg1: i32) -> (i32, i32) {
    %c0_i32 = arith.constant 0 : i32
    %c0_i32_0 = arith.constant 0 : i32
    %c0_i32_1 = arith.constant 0 : i32
    return %c0_i32, %c0_i32_0 : i32, i32
  }
  func.func @transform_8(%arg0: i32, %arg1: i32) -> (i32, i32, i32) {
    %c0_i32 = arith.constant 0 : i32
    %c0_i32_0 = arith.constant 0 : i32
    return %arg0, %c0_i32, %arg1 : i32, i32, i32
  }
}

</mosaic_0001>

<bundles_post_ra>
// kernel: tpu_custom_call.1
= control target key start
LH: loop header
LB: loop body
LE: loop exit
PB: predicated region body
PF: predicated region fallthrough
CT: control target
= control target key end

     0   :  { %13 = vsyncpa [#allocation3], 0  ;;  %s1911_s0 = inlined_call_operand.vmem [shape: bf16[2,4,256], index: 0, kind: input, shape index: {}]   ;;  %s1912_s1 = inlined_call_operand.vmem [shape: bf16[4,36,256], index: 1, kind: input, shape index: {}]   ;;  %s1913_s2 = inlined_call_operand.vmem [shape: bf16[2,4,8,36], index: 2, kind: input, shape index: {}]   ;;  %s1914_s3 = inlined_call_operand.vmem [shape: bf16[4,4], index: 3, kind: input, shape index: {}]   ;;  %s1915_s4 = inlined_call_operand.vmem [shape: f32[4,1], index: 4, kind: input, shape index: {}]   ;;  %s1916_s5 = inlined_call_operand.vmem [shape: bf16[32,4], index: 5, kind: input, shape index: {}]   ;;  %s1917_s6 = inlined_call_operand.vmem [shape: bf16[32,4], index: 6, kind: input, shape index: {}]   ;;  %s1918_s7 = inlined_call_operand.vmem [shape: f32[32,1], index: 7, kind: input, shape index: {}]   ;;  %s1919_s8 = inlined_call_operand.hbm [shape: bf16[2,32,256], index: 8, kind: output, shape index: {}]  }
   0x1   :  { %15 = vsyncpa [#allocation3 + $0x1], 0  ;;  %s1624_s27 = smov 0   ;;  %s1626_s28 = smov 0  }
   0x2   :  { %s1628_s29 = smov 0   ;;  %s1630_s30 = smov 0  }
   0x3   :  { %s1632_s9 = smov 0   ;;  %s1634_s10 = smov 0  }
   0x4 LB: > { %s1257_s11 = sadd.s32 4294967295, %s1573_s10   ;;  %s1258_s12 = sadd.s32 4294967294, %s1573_s10   ;;  %s1573_s10 = sphi %s1634_s10, %s21_s10   ;;  %s1569_s9 = sphi %s1632_s9, %s1926_s9   ;;  %s1565_s30 = sphi %s1630_s30, %s1925_s30   ;;  %s1561_s29 = sphi %s1628_s29, %s1924_s29   ;;  %s1557_s28 = sphi %s1626_s28, %s1923_s28   ;;  %s1553_s27 = sphi %s1624_s27, %s1922_s27  }
   0x5   : > { %s33_s13 = sadd.s32 1, %s1569_s9  ;;  %s227_s14 = sadd.s32 1, %s1561_s29 }
   0x6   : > { %p35_p0 = scmp.ge.s32.totalorder %s33_s13, 2  ;;  %p237_p1 = scmp.ne.s32.totalorder %s1561_s29, %s1557_s28 }
   0x7   : > { %p238_p2 = scmp.eq.s32.totalorder %s1257_s11, 1  ;;  %p243_p3 = scmp.ne.s32.totalorder %s1557_s28, %s1553_s27 }
   0x8   : > { %s1928_s13 = smov (%p35_p0, %s33_s13), 0  ;;  %p244_p5 = scmp.eq.s32.totalorder %s1258_s12, 1 }
   0x9   : > { %p1664_p4 = por %p238_p2, %p237_p1  ;;  %s222_s16 = ssub.s32 %s1569_s9, %s1928_s13 }
   0xa   : > { %p1262_p6 = scmp.ge.s32.totalorder %s1573_s10, 1  ;;  %p225_p7 = scmp.eq.s32.totalorder %s222_s16, 0 }
   0xb   : > { %p1671_p8 = por %p244_p5, %p243_p3  ;;  %p307_p9 = scmp.lt.s32.totalorder %s1573_s10, 3 }
   0xc   : > { %s1677_s18 = scalar_select %p225_p7, %s1561_s29, %s227_s14  }
   0xd   : > { %p308_p10 = pnand %p1262_p6, %p307_p9 }
   0xe   : > { %v1423_v0 = vld [vmem:[%s1912_s1 + $0x54] ss:$8 sps:$4 sm:$0xff] (!%p308_p10)   ;;  %p356_p11 = scmp.lt.s32.totalorder (!%p308_p10), %s1565_s30, 1  ;;  %v1425_v1 = vld [vmem:[%s1912_s1 + $0x50] ss:$8 sps:$4 sm:$0xff] (!%p308_p10)   ;;  %v1575_v3 = vmov (!%p308_p10), 0  }
   0xf   : > { %311 = sbr.rel (%p308_p10) target bundleno = 587 (0x24b), region = 52  ;;  %719 = vmatprep.subr.bf16.mxu1 (!%p308_p10), %v1423_v0  ;;  %v1426_v2 = vld [vmem:[%s1912_s1 + $0x64] ss:$8 sps:$4 sm:$0xff] (!%p308_p10)   ;;  %439 = vmatprep.mubr.bf16.mxu0 (!%p308_p10), %v1575_v3  ;;  %v1428_v4 = vld [vmem:[%s1912_s1 + $0x60] ss:$8 sps:$4 sm:$0xff] (!%p308_p10)   ;;  %vm400_vm0 = vcmask (!%p308_p10), 1041408  }
  0x10   : > { %720 = vmatpush1.bf16.msra.mxu1 (!%p308_p10), %v1425_v1  ;;  %v1301_v5 = vld [vmem:[%s1912_s1 + $0x70] sm:$0x33] (!%p308_p10)  ;;  %751 = vmatprep.mubr.bf16.mxu1 (!%p308_p10), %v1575_v3  ;;  %v1433_v11 = vld [vmem:[%s1912_s1 + $0x4] ss:$8 sps:$4 sm:$0xff] (!%p308_p10)   ;;  %vm396_vm1 = vcmask (!%p308_p10), 31744   ;;  %vm479_vm2 = vcmask (!%p308_p10), 293888  }
  0x11   : > { %721 = vmatprep.subr.bf16.mxu1 (!%p308_p10), %v1426_v2  ;;  %v1308_v6 = vcombine.high (!%p308_p10), %v1301_v5, %v1301_v5  ;;  %v1307_v7 = vcombine.low (!%p308_p10), %v1301_v5, %v1301_v5  ;;  %1421 = vset.pattern.permute.xlu0 (!%p308_p10), %v1575_v3  ;;  %v380_v13 = vld [vmem:[%s1914_s3] sm:$0x3] (!%p308_p10)  ;;  %v1436_v16 = vld [vmem:[%s1912_s1 + $0x14] ss:$8 sps:$4 sm:$0xff] (!%p308_p10)   ;;  %v1434_v18 = vld [vmem:[%s1912_s1 + $0x10] ss:$8 sps:$4 sm:$0xff] (!%p308_p10)  }
  0x12   : > { %1422 = vset.pattern.permute.xlu1 (!%p308_p10), %v1575_v3  ;;  %v1431_v14 = vld [vmem:[%s1912_s1] ss:$8 sps:$4 sm:$0xff] (!%p308_p10)   ;;  %v1441_v24 = vld [vmem:[%s1912_s1 + $0x2c] ss:$8 sps:$4 sm:$0xff] (!%p308_p10)   ;;  %v1070_v25 = vld [vmem:[%s1918_s7 + $0x18] sm:$0xff] (!%p308_p10)  ;;  %s1354_s23 = sshll.u32 (!%p308_p10), %s1565_s30, 9 }
  0x13   : > { %v714_v12 = vsel (!%p308_p10), %vm400_vm0, %v1307_v7, 0  ;;  %v452_v17 = vld [vmem:[%s1912_s1 + $0x20] sm:$0x33] (!%p308_p10)  ;;  %v1439_v27 = vld [vmem:[%s1912_s1 + $0x28] ss:$8 sps:$4 sm:$0xff] (!%p308_p10)   ;;  %s1576_s12 = smov (!%p308_p10), [#allocation2]  }
  0x14   : > { %722 = vmatpush1.bf16.msra.mxu1 (!%p308_p10), %v1428_v4  ;;  %v381_v19 = vld [vmem:[%s1915_s4] sm:$0xf] (!%p308_p10)  ;;  %v1276_v20 = vcombine.high (!%p308_p10), %v452_v17, %v452_v17  ;;  %v1275_v21 = vcombine.low (!%p308_p10), %v452_v17, %v452_v17  ;;  %v1444_v28 = vld [vmem:[%s1912_s1 + $0x3c] ss:$8 sps:$4 sm:$0xff] (!%p308_p10)   ;;  %v1285_v29 = vld [vmem:[%s1912_s1 + $0x48] sm:$0x33] (!%p308_p10) }
  0x15   : > { %1309 = vmatprep.subr.msk.bf16.mxu1 (!%p308_p10), %vm400_vm0, %v1308_v6  ;;  %384 = vperm.xlu0 (!%p308_p10), %1421, %v381_v19   ;;  %v1067_v22 = vld [vmem:[%s1918_s7] sm:$0xff] (!%p308_p10)  ;;  %v1292_v31 = vcombine.high (!%p308_p10), %v1285_v29, %v1285_v29  ;;  %v1291_v32 = vcombine.low (!%p308_p10), %v1285_v29, %v1285_v29  ;;  %v1452_v37 = vld [vmem:[%s1912_s1 + $0x8c] ss:$8 sps:$4 sm:$0xff] (!%p308_p10)   ;;  %v1317_v38 = vld [vmem:[%s1912_s1 + $0x98] sm:$0x33] (!%p308_p10)  ;;  %s1499_s14 = sshll.u32 (!%p308_p10), %s1576_s12, 4  ;;  %s1500_s14 = int_to_ptr.vmem [resolvable:$false] %s1499_s14 }
  0x16   : > { %s357_s25 = scalar_select %p356_p11, %s1565_s30, 1  ;;  %v484_v23 = vsel %vm400_vm0, %v1275_v21, 0  ;;  %v1442_v30 = vld [vmem:[%s1912_s1 + $0x38] ss:$8 sps:$4 sm:$0xff]   ;;  %v1449_v34 = vld [vmem:[%s1912_s1 + $0x7c] ss:$8 sps:$4 sm:$0xff]   ;;  %v1324_v40 = vcombine.high %v1317_v38, %v1317_v38  ;;  %v1323_v41 = vcombine.low %v1317_v38, %v1317_v38 }
  0x17   : > { %v599_v33 = vsel %vm400_vm0, %v1291_v32, 0  ;;  %v1447_v36 = vld [vmem:[%s1912_s1 + $0x78] ss:$8 sps:$4 sm:$0xff]   ;;  %v1450_v39 = vld [vmem:[%s1912_s1 + $0x88] ss:$8 sps:$4 sm:$0xff]  }
  0x18   : > { %s1348_s16 = sshll.u32 %s357_s25, 2  ;;  %s1349_s19 = sshll.u32 %s357_s25, 4  ;;  %724 = vmatpush1.bf16.msra.mxu1 %v714_v12  ;;  %v829_v42 = vsel %vm400_vm0, %v1323_v41, 0  ;;  %v1455_v44 = vld [vmem:[%s1917_s6] sm:$0xff]   ;;  %v1456_v45 = vld [vmem:[%s1917_s6 + $0x8] sm:$0xff]   ;;  %v1069_v47 = vld [vmem:[%s1918_s7 + $0x10] sm:$0xff] }
  0x19   : > { %s363_s22 = scalar_lea.vmem %s1911_s0, %s1348_s16  ;;  %s1706_s26 = scalar_lea.vmem %s1913_s2, %s1349_s19  ;;  %1073 = vperm.xlu0 %1421, %v1067_v22   ;;  %v1068_v46 = vld [vmem:[%s1918_s7 + $0x8] sm:$0xff] }
  0x1a   : > { %v1268_v8 = vld.sshfl [vmem:[%s363_s22] sm:$0x33 pattern:$0x76325410]  ;;  %v1302_v15 = vld [vmem:[%s1706_s26 + $0x8] sm:$0xf]  ;;  %1078 = vperm.xlu1 %1422, %v1068_v46   ;;  %s1861_s25 = scalar_lea.hbm %s1919_s8, %s1354_s23 }
  0x1b   : > { %v395_v9 = vcombine.high %v1268_v8, %v1268_v8  ;;  %v402_v10 = vsel %vm400_vm0, %v1268_v8, 0  ;;  %1310 = vmatmul.mubr.msk.bf16.vlgmr.msra.gmra.mrb[0].mxu1 %vm479_vm2, %v1302_v15  ;;  %v453_v26 = vld [vmem:[%s1706_s26] sm:$0xf]  ;;  %v1286_v35 = vld [vmem:[%s1706_s26 + $0x4] sm:$0xf]  ;;  %s352_s19 = sand.u32 1, %s1557_s28  }
  0x1c   : > { %971 = vmatprep.mubr.bf16.mxu1 %v1575_v3  ;;  %v1318_v43 = vld [vmem:[%s1706_s26 + $0xc] sm:$0xf]  ;;  %s1263_s20 = sshll.u32 %s352_s19, 5  ;;  %s1865_s11 = scalar_lea.sflag [#allocation3], %s352_s19 }
  0x1d   : > { %1269 = vmatprep.subr.msk.bf16.mxu0 %vm400_vm0, %v395_v9  ;;  %1331 = vmatprep.subr.msk.bf16.mxu1 %vm400_vm0, %v395_v9  ;;  %s354_s21 = scalar_lea.vmem [#allocation2], %s1263_s20  ;;  %s1501_s16 = scalar_lea.vmem %s1500_s14, 1024 }
  0x1e   : > { %408 = vmatpush1.bf16.msra.mxu0 %v402_v10  ;;  %940 = vmatpush1.bf16.msra.mxu1 %v402_v10  ;;  %s1151_s22 = sshll.u32 %s354_s21, 4  ;;  %s1856_s22 = int_to_ptr.vmem [resolvable:$true] %s1151_s22 }
  0x1f   : > { %489 = vmatprep.subr.bf16.mxu0 %v1433_v11  ;;  %1088 = vperm.xlu0 %1421, %v1070_v25   ;;  %s1495_s30 = scalar_lea.vmem %s1856_s22, 512  ;;  %p1502_p1 = scmp.lt.s32.totalorder %s1856_s22, %s1500_s14 }
  0x20   : > { %1083 = vperm.xlu1 %1422, %v1069_v47   ;;  %p1496_p12 = scmp.ne.s32.totalorder %s1856_s22, %s1495_s30  ;;  %p1503_p2 = scmp.lt.s32.totalorder %s1501_s16, %s1495_s30 }
  0x21   : > { %1270 = vmatmul.mubr.msk.bf16.vlgmr.msra.gmra.mrb[0].mxu0 %vm396_vm1, %v380_v13 }
  0x22   : > { %490 = vmatpush1.bf16.msra.mxu0 %v1431_v14  ;;  %521 = vmatprep.mubr.bf16.mxu0 %v1575_v3  ;;  %p1497_p13 = pnand %p1496_p12, %p1664_p4  ;;  %p1504_p3 = por %p1503_p2, %p1502_p1 }
  0x23   : > { %491 = vmatprep.subr.bf16.mxu0 %v1436_v16  ;;  %1332 = vmatmul.mubr.msk.bf16.vlgmr.msra.gmra.mrb[4].mxu1 %vm396_vm1, %v1455_v44 }
  0x24   : > { %981 = vmatprep.mubr.bf16.mxu1 %v1575_v3  ;;  %p1498_p0 = pneg %p1497_p13 }
  0x26   : > { %492 = vmatpush1.bf16.msra.mxu0 %v1434_v18  ;;  %p1505_p5 = pnand %p1504_p3, %p1498_p0 }
  0x27   : > { %1277 = vmatprep.subr.msk.bf16.mxu0 %vm400_vm0, %v1276_v20 }
  0x2a   : > { %494 = vmatpush1.bf16.msra.mxu0 %v484_v23 }
  0x2b   : > { %604 = vmatprep.subr.bf16.mxu0 %v1441_v24  ;;  %1333 = vmatmul.mubr.msk.bf16.gmra.mrb[8].mxu1 %vm396_vm1, %v1456_v45 }
  0x2c   : > { %1046 = vmatprep.mubr.bf16.mxu1 %v1575_v3 }
  0x2d   : > { %1278 = vmatmul.mubr.msk.bf16.vlgmr.msra.gmra.mrb[4].mxu0 %vm479_vm2, %v453_v26 }
  0x2e   : > { %605 = vmatpush1.bf16.msra.mxu0 %v1439_v27  ;;  %636 = vmatprep.mubr.bf16.mxu0 %v1575_v3 }
  0x2f   : > { %606 = vmatprep.subr.bf16.mxu0 %v1444_v28 }
  0x32   : > { %607 = vmatpush1.bf16.msra.mxu0 %v1442_v30 }
  0x33   : > { %1293 = vmatprep.subr.msk.bf16.mxu0 %vm400_vm0, %v1292_v31 }
  0x36   : > { %609 = vmatpush1.bf16.msra.mxu0 %v599_v33 }
  0x37   : > { %834 = vmatprep.subr.bf16.mxu0 %v1449_v34 }
  0x39   : > { %1294 = vmatmul.mubr.msk.bf16.vlgmr.msra.gmra.mrb[8].mxu0 %vm479_vm2, %v1286_v35 }
  0x3a   : > { %835 = vmatpush1.bf16.msra.mxu0 %v1447_v36  ;;  %866 = vmatprep.mubr.bf16.mxu0 %v1575_v3 }
  0x3b   : > { %836 = vmatprep.subr.bf16.mxu0 %v1452_v37 }
  0x3e   : > { %837 = vmatpush1.bf16.msra.mxu0 %v1450_v39 }
  0x3f   : > { %1325 = vmatprep.subr.msk.bf16.mxu0 %vm400_vm0, %v1324_v40 }
  0x42   : > { %839 = vmatpush1.bf16.msra.mxu0 %v829_v42 }
  0x45   : > { %1326 = vmatmul.mubr.msk.bf16.vlgmr.msra.gmra.mrb[12].mxu0 %vm479_vm2, %v1318_v43 }
  0x94   : > { %v385_v48 = vpop.permute.xlu0 %384 }
  0xee   : > { %v1807_v52 = vpop.f32.mrb[0].mxu1 }
  0xef   : > { %v762_v55 = vrot.slane %v1807_v52, 4  ;;  %v1812_v56 = vpop.f32.mrb[1].mxu1 }
  0xf0   : > { %v763_v58 = vrot.slane %v1812_v56, 4  ;;  %v757_v59 = vpop.f32.mrb[2].mxu1 }
  0xf1   : > { %v758_v61 = vpop.f32.mrb[3].mxu1 }
  0xf4   : > { %v441_v49 = vpop.f32.mrb[0].mxu0 }
  0xf5   : > { %v1805_v50 = vadd.f32 %v441_v49, %v385_v48  ;;  %v443_v51 = vpop.f32.mrb[1].mxu0 }
  0xf6   : > { %v1809_v53 = vadd.f32 %v443_v51, %v385_v48  ;;  %v445_v54 = vpop.f32.mrb[2].mxu0 }
  0xf7   : > { %v446_v57 = vpop.f32.mrb[3].mxu0  ;;  %v766_v60 = vsub.f32 %v1805_v50, %v762_v55 }
  0xf8   : > { %v767_v62 = vsub.f32 %v1809_v53, %v763_v58 }
  0xf9   : > { %v768_v63 = vpack.c.bf16 %v766_v60, %v766_v60 }
  0xfa   : > { %v769_v0 = vpack.c.bf16 %v767_v62, %v767_v62 }
  0xfb   : > { %v1311_v1 = vmul.bf16 3216621497, %v768_v63 }
  0xfc   : > { %v1312_v2 = vmul.bf16 3216621497, %v769_v0 }
  0xfd   : > { %1459 = vpow.bf16 %v1311_v1 }
  0xfe   : > { %1461 = vpow.bf16 %v1312_v2 }
 0x100   : > { %v1817_v4 = vpop.f32.mrb[4].mxu0 }
 0x101   : > { %v532_v5 = vrot.slane %v1817_v4, 4  ;;  %v1820_v6 = vpop.f32.mrb[5].mxu0 }
 0x102   : > { %v533_v7 = vrot.slane %v1820_v6, 4  ;;  %v527_v8 = vpop.f32.mrb[6].mxu0 }
 0x103   : > { %v536_v9 = vsub.f32 %v1805_v50, %v532_v5  ;;  %v528_v10 = vpop.f32.mrb[7].mxu0 }
 0x104   : > { %v537_v11 = vsub.f32 %v1809_v53, %v533_v7 }
 0x105   : > { %v538_v12 = vpack.c.bf16 %v536_v9, %v536_v9 }
 0x106   : > { %v539_v13 = vpack.c.bf16 %v537_v11, %v537_v11 }
 0x107   : > { %v1279_v14 = vmul.bf16 3216621497, %v538_v12 }
 0x108   : > { %v1280_v15 = vmul.bf16 3216621497, %v539_v13  ;;  %v1460_v16 = vpop.eup %1459 }
 0x109   : > { %1463 = vpow.bf16 %v1279_v14  ;;  %v1462_v17 = vpop.eup %1461  ;;  %v778_v18 = vadd.bf16 1065369472, %v1460_v16 }
 0x10a   : > { %1465 = vpow.bf16 %v1280_v15  ;;  %v779_v19 = vadd.bf16 1065369472, %v1462_v17 }
 0x10b   : > { %1467 = vrcp.bf16 %v778_v18 }
 0x10c   : > { %v1825_v20 = vpop.f32.mrb[8].mxu0  ;;  %1469 = vrcp.bf16 %v779_v19 }
 0x10d   : > { %v647_v21 = vrot.slane %v1825_v20, 4  ;;  %v1828_v22 = vpop.f32.mrb[9].mxu0 }
 0x10e   : > { %v648_v23 = vrot.slane %v1828_v22, 4  ;;  %v642_v24 = vpop.f32.mrb[10].mxu0 }
 0x10f   : > { %v651_v25 = vsub.f32 %v1805_v50, %v647_v21  ;;  %v643_v26 = vpop.f32.mrb[11].mxu0 }
 0x110   : > { %v652_v27 = vsub.f32 %v1809_v53, %v648_v23 }
 0x111   : > { %v653_v28 = vpack.c.bf16 %v651_v25, %v651_v25 }
 0x112   : > { %v654_v29 = vpack.c.bf16 %v652_v27, %v652_v27 }
 0x113   : > { %v1295_v30 = vmul.bf16 3216621497, %v653_v28 }
 0x114   : > { %v1464_v31 = vpop.eup %1463  ;;  %v1296_v32 = vmul.bf16 3216621497, %v654_v29 }
 0x115   : > { %v1466_v33 = vpop.eup %1465  ;;  %v548_v34 = vadd.bf16 1065369472, %v1464_v31  ;;  %1471 = vpow.bf16 %v1295_v30 }
 0x116   : > { %v549_v35 = vadd.bf16 1065369472, %v1466_v33  ;;  %1473 = vpow.bf16 %v1296_v32  ;;  %v1468_v36 = vpop.eup %1467 }
 0x117   : > { %1475 = vrcp.bf16 %v548_v34  ;;  %v1470_v37 = vpop.eup %1469  ;;  %v781_v38 = vmul.bf16 1065369472, %v1468_v36 }
 0x118   : > { %1477 = vrcp.bf16 %v549_v35  ;;  %v868_v39 = vpop.f32.mrb[12].mxu0  ;;  %v783_v40 = vmul.bf16 1065369472, %v1470_v37 }
 0x119   : > { %v877_v41 = vrot.slane %v868_v39, 4  ;;  %v870_v42 = vpop.f32.mrb[13].mxu0  ;;  %v784_v43 = vunpack.c.l.bf16 %v781_v38 }
 0x11a   : > { %v878_v44 = vrot.slane %v870_v42, 4  ;;  %v872_v45 = vpop.f32.mrb[14].mxu0  ;;  %v785_v46 = vunpack.c.l.bf16 %v783_v40 }
 0x11b   : > { %v881_v47 = vsub.f32 %v1805_v50, %v877_v41  ;;  %v873_v48 = vpop.f32.mrb[15].mxu0  ;;  %v786_v49 = vmul.f32 %v784_v43, %v1807_v52 }
 0x11c   : > { %v882_v51 = vsub.f32 %v1809_v53, %v878_v44  ;;  %v787_v54 = vmul.f32 %v785_v46, %v1812_v56  ;;  %v1074_v48 = vpop.permute.xlu0 %1073 }
 0x11d   : > { %v883_v55 = vpack.c.bf16 %v881_v47, %v881_v47 }
 0x11e   : > { %v884_v57 = vpack.c.bf16 %v882_v51, %v882_v51  ;;  %v1079_v51 = vpop.permute.xlu1 %1078 }
 0x11f   : > { %v1327_v58 = vmul.bf16 3216621497, %v883_v55 }
 0x120   : > { %v1472_v59 = vpop.eup %1471  ;;  %v1328_v60 = vmul.bf16 3216621497, %v884_v57 }
 0x121   : > { %v1474_v61 = vpop.eup %1473  ;;  %v663_v62 = vadd.bf16 1065369472, %v1472_v59  ;;  %1479 = vpow.bf16 %v1327_v58 }
 0x122   : > { %v1476_v63 = vpop.eup %1475  ;;  %v664_v0 = vadd.bf16 1065369472, %v1474_v61  ;;  %1481 = vpow.bf16 %v1328_v60 }
 0x123   : > { %v1478_v1 = vpop.eup %1477  ;;  %v551_v50 = vmul.bf16 1065369472, %v1476_v63  ;;  %1483 = vrcp.bf16 %v663_v62 }
 0x124   : > { %v553_v2 = vmul.bf16 1065369472, %v1478_v1  ;;  %1485 = vrcp.bf16 %v664_v0 }
 0x125   : > { %v554_v52 = vunpack.c.l.bf16 %v551_v50  ;;  %v1084_v50 = vpop.permute.xlu1 %1083 }
 0x126   : > { %v555_v53 = vunpack.c.l.bf16 %v553_v2 }
 0x127   : > { %v556_v56 = vmul.f32 %v554_v52, %v1817_v4 }
 0x128   : > { %v557_v5 = vmul.f32 %v555_v53, %v1820_v6 }
 0x12c   : > { %v1480_v7 = vpop.eup %1479 }
 0x12d   : > { %v1482_v8 = vpop.eup %1481  ;;  %v893_v9 = vadd.bf16 1065369472, %v1480_v7 }
 0x12e   : > { %v1484_v10 = vpop.eup %1483  ;;  %v894_v11 = vadd.bf16 1065369472, %v1482_v8 }
 0x12f   : > { %v1486_v12 = vpop.eup %1485  ;;  %v666_v13 = vmul.bf16 1065369472, %v1484_v10  ;;  %1487 = vrcp.bf16 %v893_v9 }
 0x130   : > { %v668_v14 = vmul.bf16 1065369472, %v1486_v12  ;;  %1489 = vrcp.bf16 %v894_v11 }
 0x131   : > { %v669_v15 = vunpack.c.l.bf16 %v666_v13 }
 0x132   : > { %v670_v16 = vunpack.c.l.bf16 %v668_v14 }
 0x133   : > { %v671_v17 = vmul.f32 %v669_v15, %v1825_v20  ;;  %v675_v18 = vadd.f32 %v669_v15, %v554_v52 }
 0x134   : > { %v672_v19 = vmul.f32 %v670_v16, %v1828_v22  ;;  %v676_v4 = vadd.f32 %v670_v16, %v555_v53 }
 0x135   : > { %v673_v21 = vadd.f32 %v671_v17, %v556_v56  ;;  %v790_v6 = vadd.f32 %v784_v43, %v675_v18 }
 0x136   : > { %v674_v23 = vadd.f32 %v672_v19, %v557_v5  ;;  %v791_v24 = vadd.f32 %v785_v46, %v676_v4  ;;  %v1089_v5 = vpop.permute.xlu0 %1088 }
 0x137   : > { %v788_v25 = vadd.f32 %v786_v49, %v673_v21 }
 0x138   : > { %v789_v26 = vadd.f32 %v787_v54, %v674_v23 }
 0x13a   : > { %v1488_v27 = vpop.eup %1487 }
 0x13b   : > { %v1490_v28 = vpop.eup %1489  ;;  %v896_v29 = vmul.bf16 1065369472, %v1488_v27 }
 0x13c   : > { %v898_v30 = vmul.bf16 1065369472, %v1490_v28 }
 0x13d   : > { %v899_v31 = vunpack.c.l.bf16 %v896_v29 }
 0x13e   : > { %v900_v32 = vunpack.c.l.bf16 %v898_v30 }
 0x13f   : > { %v901_v33 = vmul.f32 %v899_v31, %v868_v39  ;;  %v905_v34 = vadd.f32 %v899_v31, %v790_v6  ;;  %v1457_v39 = vld [vmem:[%s1916_s5] sm:$0xff]  }
 0x140   : > { %v902_v35 = vmul.f32 %v900_v32, %v870_v42  ;;  %v906_v20 = vadd.f32 %v900_v32, %v791_v24  ;;  %v1458_v42 = vld [vmem:[%s1916_s5 + $0x8] sm:$0xff]  }
 0x141   : > { %v903_v36 = vadd.f32 %v901_v33, %v788_v25  ;;  %v907_v37 = vadd.f32 1e-06, %v905_v34 }
 0x142   : > { %v904_v22 = vadd.f32 %v902_v35, %v789_v26  ;;  %v908_v38 = vadd.f32 1e-06, %v906_v20 }
 0x143   : > { %1491 = vrcp.f32 %v907_v37 }
 0x144   : > { %1493 = vrcp.f32 %v908_v38 }
 0x14d   : > { %v1492_v40 = vpop.eup %1491 }
 0x14e   : > { %v1494_v41 = vpop.eup %1493  ;;  %v911_v43 = vmul.f32 %v1492_v40, %v903_v36 }
 0x14f   : > { %v912_v44 = vmul.f32 %v1494_v41, %v904_v22 }
 0x150   : > { %v917_v45 = vpack.c.bf16 %v911_v43, %v911_v43 }
 0x151   : > { %v918_v46 = vpack.c.bf16 %v912_v44, %v912_v44 }
 0x152   : > { %v1009_v47 = vsel %vm400_vm0, %v917_v45, 0 }
 0x153   : > { %1336 = vmatprep.subr.msk.bf16.mxu1 %vm400_vm0, %v918_v46 }
 0x154   : > { %1015 = vmatpush1.bf16.msra.mxu1 %v1009_v47 }
 0x157   : > { %1337 = vmatmul.mubr.msk.bf16.vlgmr.msra.gmra.mrb[4].mxu1 %vm396_vm1, %v1457_v39 }
 0x158   : > { %1056 = vmatprep.mubr.bf16.mxu1 %v1575_v3 }
 0x15f   : > { %1338 = vmatmul.mubr.msk.bf16.gmra.mrb[8].mxu1 %vm396_vm1, %v1458_v42 }
 0x22a   : > { %v1048_v49 = vpop.f32.mrb[4].mxu1 }
 0x22b   : > { %v1091_v54 = vadd.f32 %v1074_v48, %v1048_v49  ;;  %v1050_v55 = vpop.f32.mrb[5].mxu1 }
 0x22c   : > { %v1092_v57 = vadd.f32 %v1074_v48, %v1050_v55  ;;  %v1052_v58 = vpop.f32.mrb[6].mxu1 }
 0x22d   : > { %v1099_v59 = vmax.f32 %v1091_v54, 0.0  ;;  %v1093_v60 = vadd.f32 %v1079_v51, %v1052_v58  ;;  %v1054_v61 = vpop.f32.mrb[7].mxu1 }
 0x22e   : > { %v1100_v3 = vmax.f32 %v1092_v57, 0.0  ;;  %v1094_v62 = vadd.f32 %v1079_v51, %v1054_v61 }
 0x22f   : > { %v1101_v63 = vmax.f32 %v1093_v60, 0.0 }
 0x230   : > { %v1350_v0 = vpack.c.bf16 %v1100_v3, %v1099_v59  ;;  %v1102_v1 = vmax.f32 %v1094_v62, 0.0 }
 0x232   : > { %1131 = vst [vmem:[%s354_s21] sm:$0xff] %v1350_v0  ;;  %v1351_v2 = vpack.c.bf16 %v1102_v1, %v1101_v63  ;;  %v1058_v52 = vpop.f32.mrb[8].mxu1 }
 0x233   : > { %v1095_v53 = vadd.f32 %v1084_v50, %v1058_v52  ;;  %v1060_v56 = vpop.f32.mrb[9].mxu1 }
 0x234   : > { %1132 = vst [vmem:[%s354_s21 + $0x8] sm:$0xff] %v1351_v2  ;;  %v1096_v7 = vadd.f32 %v1084_v50, %v1060_v56  ;;  %v1062_v8 = vpop.f32.mrb[10].mxu1 }
 0x235   : > { %v1103_v9 = vmax.f32 %v1095_v53, 0.0  ;;  %v1097_v10 = vadd.f32 %v1089_v5, %v1062_v8  ;;  %v1064_v11 = vpop.f32.mrb[11].mxu1 }
 0x236   : > { %v1104_v12 = vmax.f32 %v1096_v7, 0.0  ;;  %v1098_v13 = vadd.f32 %v1089_v5, %v1064_v11 }
 0x237   : > { %v1105_v14 = vmax.f32 %v1097_v10, 0.0 }
 0x238   : > { %v1352_v15 = vpack.c.bf16 %v1104_v12, %v1103_v9  ;;  %v1106_v16 = vmax.f32 %v1098_v13, 0.0 }
 0x23a   : > { %1133 = vst [vmem:[%s354_s21 + $0x10] sm:$0xff] %v1352_v15  ;;  %v1353_v17 = vpack.c.bf16 %v1106_v16, %v1105_v14 }
 0x23c   : > { %1134 = vst [vmem:[%s354_s21 + $0x18] sm:$0xff] %v1353_v17 }
 0x23d   : > { %1508 = shalt.err (!%p1505_p5)
}
 0x23e   : > { %s1509_s19 = scalar_lea.hbm %s1861_s25, 512  ;;  %s1513_s23 = scalar_lea.hbm %s1919_s8, 1024 }
 0x23f   : > { %p1510_p6 = scmp.ne.s32.totalorder %s1861_s25, %s1509_s19  ;;  %p1514_p10 = scmp.lt.u32.totalorder %s1861_s25, %s1919_s8 }
 0x240   : > { %p1515_p11 = scmp.lt.u32.totalorder %s1513_s23, %s1509_s19  ;;  %p1517_p13 = scmp.lt.u32.totalorder %s1509_s19, %s1861_s25 }
 0x241   : > { %p1511_p7 = pnand %p1510_p6, %p1664_p4 }
 0x242   : > { %p1516_p12 = por %p1515_p11, %p1514_p10 }
 0x243   : > { %p1512_p9 = pneg %p1511_p7 }
 0x244   : > { %p1518_p0 = por %p1517_p13, %p1516_p12 }
 0x246   : > { %p1519_p1 = pnand %p1518_p0, %p1512_p9 }
 0x248   : > { %1522 = shalt.err (!%p1519_p1)
}
 0x249   : > { %s1577_s30 = smov 128   ;;  %s1578_s12 = smov 8  }
 0x24a   : > { %1363 = dma.vmem_to_hbm [thread:$0]  (%p1664_p4), %s1856_s22, 512, %s1861_s25, %s1865_s11, %s1577_s30, %s1577_s30, %s1578_s12  }
 0x24b PF: > { %p1369_p2 = scmp.ge.s32.totalorder %s1573_s10, 2  ;;  %s1166_s14 = sand.u32 1, %s1553_s27  }
 0x24c   : > { %s1167_s16 = scalar_lea.sflag [#allocation3], %s1166_s14 }
 0x24d   : > { %p1366_p3 = pnand %p1369_p2, %p1671_p8 }
 0x24f   : > { %1548 = dma.done.wait (!%p1366_p3), %s1167_s16, 512  }
 0x250   : > { %1550 = vsyncadd (!%p1366_p3), %s1167_s16, 4294966784  ;;  %s21_s10 = sadd.s32 1, %s1573_s10   ;;  %s1922_s27 = smov %s1557_s28 }
 0x251   : > { %p18_p5 = scmp.ge.s32.totalorder %s21_s10, 4   ;;  %s1923_s28 = smov %s1561_s29 }
 0x252   : > { %s1924_s29 = smov %s1677_s18  ;;  %s1925_s30 = smov %s1569_s9 }
 0x253   : > { %s1926_s9 = smov %s1928_s13  ;;  %20 = sbr.rel (!%p18_p5) target bundleno = 4 (0x4), region = 99 }
 0x25a   :  { %1172 = vsyncpa [#allocation3], 1 }
 0x25b   :  { %1174 = vsyncpa [#allocation3 + $0x1], 1 }

// kernel: tpu_custom_call.1
= control target key start
LH: loop header
LB: loop body
LE: loop exit
PB: predicated region body
PF: predicated region fallthrough
CT: control target
= control target key end

     0   :  { %13 = vsyncpa [#allocation3], 0  ;;  %s1911_s0 = inlined_call_operand.vmem [shape: bf16[2,4,256], index: 0, kind: input, shape index: {}]   ;;  %s1912_s1 = inlined_call_operand.vmem [shape: bf16[4,36,256], index: 1, kind: input, shape index: {}]   ;;  %s1913_s2 = inlined_call_operand.vmem [shape: bf16[2,4,8,36], index: 2, kind: input, shape index: {}]   ;;  %s1914_s3 = inlined_call_operand.vmem [shape: bf16[4,4], index: 3, kind: input, shape index: {}]   ;;  %s1915_s4 = inlined_call_operand.vmem [shape: f32[4,1], index: 4, kind: input, shape index: {}]   ;;  %s1916_s5 = inlined_call_operand.vmem [shape: bf16[32,4], index: 5, kind: input, shape index: {}]   ;;  %s1917_s6 = inlined_call_operand.vmem [shape: bf16[32,4], index: 6, kind: input, shape index: {}]   ;;  %s1918_s7 = inlined_call_operand.vmem [shape: f32[32,1], index: 7, kind: input, shape index: {}]   ;;  %s1919_s8 = inlined_call_operand.hbm [shape: bf16[2,32,256], index: 8, kind: output, shape index: {}]  }
   0x1   :  { %15 = vsyncpa [#allocation3 + $0x1], 0  ;;  %s1624_s27 = smov 0   ;;  %s1626_s28 = smov 0  }
   0x2   :  { %s1628_s29 = smov 0   ;;  %s1630_s30 = smov 0  }
   0x3   :  { %s1632_s9 = smov 0   ;;  %s1634_s10 = smov 0  }
   0x4 LB: > { %s1257_s11 = sadd.s32 4294967295, %s1573_s10   ;;  %s1258_s12 = sadd.s32 4294967294, %s1573_s10   ;;  %s1573_s10 = sphi %s1634_s10, %s21_s10   ;;  %s1569_s9 = sphi %s1632_s9, %s1926_s9   ;;  %s1565_s30 = sphi %s1630_s30, %s1925_s30   ;;  %s1561_s29 = sphi %s1628_s29, %s1924_s29   ;;  %s1557_s28 = sphi %s1626_s28, %s1923_s28   ;;  %s1553_s27 = sphi %s1624_s27, %s1922_s27  }
   0x5   : > { %s33_s13 = sadd.s32 1, %s1569_s9  ;;  %s227_s14 = sadd.s32 1, %s1561_s29 }
   0x6   : > { %p35_p0 = scmp.ge.s32.totalorder %s33_s13, 2  ;;  %p237_p1 = scmp.ne.s32.totalorder %s1561_s29, %s1557_s28 }
   0x7   : > { %p238_p2 = scmp.eq.s32.totalorder %s1257_s11, 1  ;;  %p243_p3 = scmp.ne.s32.totalorder %s1557_s28, %s1553_s27 }
   0x8   : > { %s1928_s13 = smov (%p35_p0, %s33_s13), 0  ;;  %p244_p5 = scmp.eq.s32.totalorder %s1258_s12, 1 }
   0x9   : > { %p1664_p4 = por %p238_p2, %p237_p1  ;;  %s222_s16 = ssub.s32 %s1569_s9, %s1928_s13 }
   0xa   : > { %p1262_p6 = scmp.ge.s32.totalorder %s1573_s10, 1  ;;  %p225_p7 = scmp.eq.s32.totalorder %s222_s16, 0 }
   0xb   : > { %p1671_p8 = por %p244_p5, %p243_p3  ;;  %p307_p9 = scmp.lt.s32.totalorder %s1573_s10, 3 }
   0xc   : > { %s1677_s18 = scalar_select %p225_p7, %s1561_s29, %s227_s14  }
   0xd   : > { %p308_p10 = pnand %p1262_p6, %p307_p9 }
   0xe   : > { %v1423_v0 = vld [vmem:[%s1912_s1 + $0x54] ss:$8 sps:$4 sm:$0xff] (!%p308_p10)   ;;  %p356_p11 = scmp.lt.s32.totalorder (!%p308_p10), %s1565_s30, 1  ;;  %v1425_v1 = vld [vmem:[%s1912_s1 + $0x50] ss:$8 sps:$4 sm:$0xff] (!%p308_p10)   ;;  %v1575_v3 = vmov (!%p308_p10), 0  }
   0xf   : > { %311 = sbr.rel (%p308_p10) target bundleno = 587 (0x24b), region = 52  ;;  %719 = vmatprep.subr.bf16.mxu1 (!%p308_p10), %v1423_v0  ;;  %v1426_v2 = vld [vmem:[%s1912_s1 + $0x64] ss:$8 sps:$4 sm:$0xff] (!%p308_p10)   ;;  %439 = vmatprep.mubr.bf16.mxu0 (!%p308_p10), %v1575_v3  ;;  %v1428_v4 = vld [vmem:[%s1912_s1 + $0x60] ss:$8 sps:$4 sm:$0xff] (!%p308_p10)   ;;  %vm400_vm0 = vcmask (!%p308_p10), 1041408  }
  0x10   : > { %720 = vmatpush1.bf16.msra.mxu1 (!%p308_p10), %v1425_v1  ;;  %v1301_v5 = vld [vmem:[%s1912_s1 + $0x70] sm:$0x33] (!%p308_p10)  ;;  %751 = vmatprep.mubr.bf16.mxu1 (!%p308_p10), %v1575_v3  ;;  %v1433_v11 = vld [vmem:[%s1912_s1 + $0x4] ss:$8 sps:$4 sm:$0xff] (!%p308_p10)   ;;  %vm396_vm1 = vcmask (!%p308_p10), 31744   ;;  %vm479_vm2 = vcmask (!%p308_p10), 293888  }
  0x11   : > { %721 = vmatprep.subr.bf16.mxu1 (!%p308_p10), %v1426_v2  ;;  %v1308_v6 = vcombine.high (!%p308_p10), %v1301_v5, %v1301_v5  ;;  %v1307_v7 = vcombine.low (!%p308_p10), %v1301_v5, %v1301_v5  ;;  %1421 = vset.pattern.permute.xlu0 (!%p308_p10), %v1575_v3  ;;  %v380_v13 = vld [vmem:[%s1914_s3] sm:$0x3] (!%p308_p10)  ;;  %v1436_v16 = vld [vmem:[%s1912_s1 + $0x14] ss:$8 sps:$4 sm:$0xff] (!%p308_p10)   ;;  %v1434_v18 = vld [vmem:[%s1912_s1 + $0x10] ss:$8 sps:$4 sm:$0xff] (!%p308_p10)  }
  0x12   : > { %1422 = vset.pattern.permute.xlu1 (!%p308_p10), %v1575_v3  ;;  %v1431_v14 = vld [vmem:[%s1912_s1] ss:$8 sps:$4 sm:$0xff] (!%p308_p10)   ;;  %v1441_v24 = vld [vmem:[%s1912_s1 + $0x2c] ss:$8 sps:$4 sm:$0xff] (!%p308_p10)   ;;  %v1070_v25 = vld [vmem:[%s1918_s7 + $0x18] sm:$0xff] (!%p308_p10)  ;;  %s1354_s23 = sshll.u32 (!%p308_p10), %s1565_s30, 9 }
  0x13   : > { %v714_v12 = vsel (!%p308_p10), %vm400_vm0, %v1307_v7, 0  ;;  %v452_v17 = vld [vmem:[%s1912_s1 + $0x20] sm:$0x33] (!%p308_p10)  ;;  %v1439_v27 = vld [vmem:[%s1912_s1 + $0x28] ss:$8 sps:$4 sm:$0xff] (!%p308_p10)   ;;  %s1576_s12 = smov (!%p308_p10), [#allocation2]  }
  0x14   : > { %722 = vmatpush1.bf16.msra.mxu1 (!%p308_p10), %v1428_v4  ;;  %v381_v19 = vld [vmem:[%s1915_s4] sm:$0xf] (!%p308_p10)  ;;  %v1276_v20 = vcombine.high (!%p308_p10), %v452_v17, %v452_v17  ;;  %v1275_v21 = vcombine.low (!%p308_p10), %v452_v17, %v452_v17  ;;  %v1444_v28 = vld [vmem:[%s1912_s1 + $0x3c] ss:$8 sps:$4 sm:$0xff] (!%p308_p10)   ;;  %v1285_v29 = vld [vmem:[%s1912_s1 + $0x48] sm:$0x33] (!%p308_p10) }
  0x15   : > { %1309 = vmatprep.subr.msk.bf16.mxu1 (!%p308_p10), %vm400_vm0, %v1308_v6  ;;  %384 = vperm.xlu0 (!%p308_p10), %1421, %v381_v19   ;;  %v1067_v22 = vld [vmem:[%s1918_s7] sm:$0xff] (!%p308_p10)  ;;  %v1292_v31 = vcombine.high (!%p308_p10), %v1285_v29, %v1285_v29  ;;  %v1291_v32 = vcombine.low (!%p308_p10), %v1285_v29, %v1285_v29  ;;  %v1452_v37 = vld [vmem:[%s1912_s1 + $0x8c] ss:$8 sps:$4 sm:$0xff] (!%p308_p10)   ;;  %v1317_v38 = vld [vmem:[%s1912_s1 + $0x98] sm:$0x33] (!%p308_p10)  ;;  %s1499_s14 = sshll.u32 (!%p308_p10), %s1576_s12, 4  ;;  %s1500_s14 = int_to_ptr.vmem [resolvable:$false] %s1499_s14 }
  0x16   : > { %s357_s25 = scalar_select %p356_p11, %s1565_s30, 1  ;;  %v484_v23 = vsel %vm400_vm0, %v1275_v21, 0  ;;  %v1442_v30 = vld [vmem:[%s1912_s1 + $0x38] ss:$8 sps:$4 sm:$0xff]   ;;  %v1449_v34 = vld [vmem:[%s1912_s1 + $0x7c] ss:$8 sps:$4 sm:$0xff]   ;;  %v1324_v40 = vcombine.high %v1317_v38, %v1317_v38  ;;  %v1323_v41 = vcombine.low %v1317_v38, %v1317_v38 }
  0x17   : > { %v599_v33 = vsel %vm400_vm0, %v1291_v32, 0  ;;  %v1447_v36 = vld [vmem:[%s1912_s1 + $0x78] ss:$8 sps:$4 sm:$0xff]   ;;  %v1450_v39 = vld [vmem:[%s1912_s1 + $0x88] ss:$8 sps:$4 sm:$0xff]  }
  0x18   : > { %s1348_s16 = sshll.u32 %s357_s25, 2  ;;  %s1349_s19 = sshll.u32 %s357_s25, 4  ;;  %724 = vmatpush1.bf16.msra.mxu1 %v714_v12  ;;  %v829_v42 = vsel %vm400_vm0, %v1323_v41, 0  ;;  %v1455_v44 = vld [vmem:[%s1917_s6] sm:$0xff]   ;;  %v1456_v45 = vld [vmem:[%s1917_s6 + $0x8] sm:$0xff]   ;;  %v1069_v47 = vld [vmem:[%s1918_s7 + $0x10] sm:$0xff] }
  0x19   : > { %s363_s22 = scalar_lea.vmem %s1911_s0, %s1348_s16  ;;  %s1706_s26 = scalar_lea.vmem %s1913_s2, %s1349_s19  ;;  %1073 = vperm.xlu0 %1421, %v1067_v22   ;;  %v1068_v46 = vld [vmem:[%s1918_s7 + $0x8] sm:$0xff] }
  0x1a   : > { %v1268_v8 = vld.sshfl [vmem:[%s363_s22] sm:$0x33 pattern:$0x76325410]  ;;  %v1302_v15 = vld [vmem:[%s1706_s26 + $0x8] sm:$0xf]  ;;  %1078 = vperm.xlu1 %1422, %v1068_v46   ;;  %s1861_s25 = scalar_lea.hbm %s1919_s8, %s1354_s23 }
  0x1b   : > { %v395_v9 = vcombine.high %v1268_v8, %v1268_v8  ;;  %v402_v10 = vsel %vm400_vm0, %v1268_v8, 0  ;;  %1310 = vmatmul.mubr.msk.bf16.vlgmr.msra.gmra.mrb[0].mxu1 %vm479_vm2, %v1302_v15  ;;  %v453_v26 = vld [vmem:[%s1706_s26] sm:$0xf]  ;;  %v1286_v35 = vld [vmem:[%s1706_s26 + $0x4] sm:$0xf]  ;;  %s352_s19 = sand.u32 1, %s1557_s28  }
  0x1c   : > { %971 = vmatprep.mubr.bf16.mxu1 %v1575_v3  ;;  %v1318_v43 = vld [vmem:[%s1706_s26 + $0xc] sm:$0xf]  ;;  %s1263_s20 = sshll.u32 %s352_s19, 5  ;;  %s1865_s11 = scalar_lea.sflag [#allocation3], %s352_s19 }
  0x1d   : > { %1269 = vmatprep.subr.msk.bf16.mxu0 %vm400_vm0, %v395_v9  ;;  %1331 = vmatprep.subr.msk.bf16.mxu1 %vm400_vm0, %v395_v9  ;;  %s354_s21 = scalar_lea.vmem [#allocation2], %s1263_s20  ;;  %s1501_s16 = scalar_lea.vmem %s1500_s14, 1024 }
  0x1e   : > { %408 = vmatpush1.bf16.msra.mxu0 %v402_v10  ;;  %940 = vmatpush1.bf16.msra.mxu1 %v402_v10  ;;  %s1151_s22 = sshll.u32 %s354_s21, 4  ;;  %s1856_s22 = int_to_ptr.vmem [resolvable:$true] %s1151_s22 }
  0x1f   : > { %489 = vmatprep.subr.bf16.mxu0 %v1433_v11  ;;  %1088 = vperm.xlu0 %1421, %v1070_v25   ;;  %s1495_s30 = scalar_lea.vmem %s1856_s22, 512  ;;  %p1502_p1 = scmp.lt.s32.totalorder %s1856_s22, %s1500_s14 }
  0x20   : > { %1083 = vperm.xlu1 %1422, %v1069_v47   ;;  %p1496_p12 = scmp.ne.s32.totalorder %s1856_s22, %s1495_s30  ;;  %p1503_p2 = scmp.lt.s32.totalorder %s1501_s16, %s1495_s30 }
  0x21   : > { %1270 = vmatmul.mubr.msk.bf16.vlgmr.msra.gmra.mrb[0].mxu0 %vm396_vm1, %v380_v13 }
  0x22   : > { %490 = vmatpush1.bf16.msra.mxu0 %v1431_v14  ;;  %521 = vmatprep.mubr.bf16.mxu0 %v1575_v3  ;;  %p1497_p13 = pnand %p1496_p12, %p1664_p4  ;;  %p1504_p3 = por %p1503_p2, %p1502_p1 }
  0x23   : > { %491 = vmatprep.subr.bf16.mxu0 %v1436_v16  ;;  %1332 = vmatmul.mubr.msk.bf16.vlgmr.msra.gmra.mrb[4].mxu1 %vm396_vm1, %v1455_v44 }
  0x24   : > { %981 = vmatprep.mubr.bf16.mxu1 %v1575_v3  ;;  %p1498_p0 = pneg %p1497_p13 }
  0x26   : > { %492 = vmatpush1.bf16.msra.mxu0 %v1434_v18  ;;  %p1505_p5 = pnand %p1504_p3, %p1498_p0 }
  0x27   : > { %1277 = vmatprep.subr.msk.bf16.mxu0 %vm400_vm0, %v1276_v20 }
  0x2a   : > { %494 = vmatpush1.bf16.msra.mxu0 %v484_v23 }
  0x2b   : > { %604 = vmatprep.subr.bf16.mxu0 %v1441_v24  ;;  %1333 = vmatmul.mubr.msk.bf16.gmra.mrb[8].mxu1 %vm396_vm1, %v1456_v45 }
  0x2c   : > { %1046 = vmatprep.mubr.bf16.mxu1 %v1575_v3 }
  0x2d   : > { %1278 = vmatmul.mubr.msk.bf16.vlgmr.msra.gmra.mrb[4].mxu0 %vm479_vm2, %v453_v26 }
  0x2e   : > { %605 = vmatpush1.bf16.msra.mxu0 %v1439_v27  ;;  %636 = vmatprep.mubr.bf16.mxu0 %v1575_v3 }
  0x2f   : > { %606 = vmatprep.subr.bf16.mxu0 %v1444_v28 }
  0x32   : > { %607 = vmatpush1.bf16.msra.mxu0 %v1442_v30 }
  0x33   : > { %1293 = vmatprep.subr.msk.bf16.mxu0 %vm400_vm0, %v1292_v31 }
  0x36   : > { %609 = vmatpush1.bf16.msra.mxu0 %v599_v33 }
  0x37   : > { %834 = vmatprep.subr.bf16.mxu0 %v1449_v34 }
  0x39   : > { %1294 = vmatmul.mubr.msk.bf16.vlgmr.msra.gmra.mrb[8].mxu0 %vm479_vm2, %v1286_v35 }
  0x3a   : > { %835 = vmatpush1.bf16.msra.mxu0 %v1447_v36  ;;  %866 = vmatprep.mubr.bf16.mxu0 %v1575_v3 }
  0x3b   : > { %836 = vmatprep.subr.bf16.mxu0 %v1452_v37 }
  0x3e   : > { %837 = vmatpush1.bf16.msra.mxu0 %v1450_v39 }
  0x3f   : > { %1325 = vmatprep.subr.msk.bf16.mxu0 %vm400_vm0, %v1324_v40 }
  0x42   : > { %839 = vmatpush1.bf16.msra.mxu0 %v829_v42 }
  0x45   : > { %1326 = vmatmul.mubr.msk.bf16.vlgmr.msra.gmra.mrb[12].mxu0 %vm479_vm2, %v1318_v43 }
  0x94   : > { %v385_v48 = vpop.permute.xlu0 %384 }
  0xee   : > { %v1807_v52 = vpop.f32.mrb[0].mxu1 }
  0xef   : > { %v762_v55 = vrot.slane %v1807_v52, 4  ;;  %v1812_v56 = vpop.f32.mrb[1].mxu1 }
  0xf0   : > { %v763_v58 = vrot.slane %v1812_v56, 4  ;;  %v757_v59 = vpop.f32.mrb[2].mxu1 }
  0xf1   : > { %v758_v61 = vpop.f32.mrb[3].mxu1 }
  0xf4   : > { %v441_v49 = vpop.f32.mrb[0].mxu0 }
  0xf5   : > { %v1805_v50 = vadd.f32 %v441_v49, %v385_v48  ;;  %v443_v51 = vpop.f32.mrb[1].mxu0 }
  0xf6   : > { %v1809_v53 = vadd.f32 %v443_v51, %v385_v48  ;;  %v445_v54 = vpop.f32.mrb[2].mxu0 }
  0xf7   : > { %v446_v57 = vpop.f32.mrb[3].mxu0  ;;  %v766_v60 = vsub.f32 %v1805_v50, %v762_v55 }
  0xf8   : > { %v767_v62 = vsub.f32 %v1809_v53, %v763_v58 }
  0xf9   : > { %v768_v63 = vpack.c.bf16 %v766_v60, %v766_v60 }
  0xfa   : > { %v769_v0 = vpack.c.bf16 %v767_v62, %v767_v62 }
  0xfb   : > { %v1311_v1 = vmul.bf16 3216621497, %v768_v63 }
  0xfc   : > { %v1312_v2 = vmul.bf16 3216621497, %v769_v0 }
  0xfd   : > { %1459 = vpow.bf16 %v1311_v1 }
  0xfe   : > { %1461 = vpow.bf16 %v1312_v2 }
 0x100   : > { %v1817_v4 = vpop.f32.mrb[4].mxu0 }
 0x101   : > { %v532_v5 = vrot.slane %v1817_v4, 4  ;;  %v1820_v6 = vpop.f32.mrb[5].mxu0 }
 0x102   : > { %v533_v7 = vrot.slane %v1820_v6, 4  ;;  %v527_v8 = vpop.f32.mrb[6].mxu0 }
 0x103   : > { %v536_v9 = vsub.f32 %v1805_v50, %v532_v5  ;;  %v528_v10 = vpop.f32.mrb[7].mxu0 }
 0x104   : > { %v537_v11 = vsub.f32 %v1809_v53, %v533_v7 }
 0x105   : > { %v538_v12 = vpack.c.bf16 %v536_v9, %v536_v9 }
 0x106   : > { %v539_v13 = vpack.c.bf16 %v537_v11, %v537_v11 }
 0x107   : > { %v1279_v14 = vmul.bf16 3216621497, %v538_v12 }
 0x108   : > { %v1280_v15 = vmul.bf16 3216621497, %v539_v13  ;;  %v1460_v16 = vpop.eup %1459 }
 0x109   : > { %1463 = vpow.bf16 %v1279_v14  ;;  %v1462_v17 = vpop.eup %1461  ;;  %v778_v18 = vadd.bf16 1065369472, %v1460_v16 }
 0x10a   : > { %1465 = vpow.bf16 %v1280_v15  ;;  %v779_v19 = vadd.bf16 1065369472, %v1462_v17 }
 0x10b   : > { %1467 = vrcp.bf16 %v778_v18 }
 0x10c   : > { %v1825_v20 = vpop.f32.mrb[8].mxu0  ;;  %1469 = vrcp.bf16 %v779_v19 }
 0x10d   : > { %v647_v21 = vrot.slane %v1825_v20, 4  ;;  %v1828_v22 = vpop.f32.mrb[9].mxu0 }
 0x10e   : > { %v648_v23 = vrot.slane %v1828_v22, 4  ;;  %v642_v24 = vpop.f32.mrb[10].mxu0 }
 0x10f   : > { %v651_v25 = vsub.f32 %v1805_v50, %v647_v21  ;;  %v643_v26 = vpop.f32.mrb[11].mxu0 }
 0x110   : > { %v652_v27 = vsub.f32 %v1809_v53, %v648_v23 }
 0x111   : > { %v653_v28 = vpack.c.bf16 %v651_v25, %v651_v25 }
 0x112   : > { %v654_v29 = vpack.c.bf16 %v652_v27, %v652_v27 }
 0x113   : > { %v1295_v30 = vmul.bf16 3216621497, %v653_v28 }
 0x114   : > { %v1464_v31 = vpop.eup %1463  ;;  %v1296_v32 = vmul.bf16 3216621497, %v654_v29 }
 0x115   : > { %v1466_v33 = vpop.eup %1465  ;;  %v548_v34 = vadd.bf16 1065369472, %v1464_v31  ;;  %1471 = vpow.bf16 %v1295_v30 }
 0x116   : > { %v549_v35 = vadd.bf16 1065369472, %v1466_v33  ;;  %1473 = vpow.bf16 %v1296_v32  ;;  %v1468_v36 = vpop.eup %1467 }
 0x117   : > { %1475 = vrcp.bf16 %v548_v34  ;;  %v1470_v37 = vpop.eup %1469  ;;  %v781_v38 = vmul.bf16 1065369472, %v1468_v36 }
 0x118   : > { %1477 = vrcp.bf16 %v549_v35  ;;  %v868_v39 = vpop.f32.mrb[12].mxu0  ;;  %v783_v40 = vmul.bf16 1065369472, %v1470_v37 }
 0x119   : > { %v877_v41 = vrot.slane %v868_v39, 4  ;;  %v870_v42 = vpop.f32.mrb[13].mxu0  ;;  %v784_v43 = vunpack.c.l.bf16 %v781_v38 }
 0x11a   : > { %v878_v44 = vrot.slane %v870_v42, 4  ;;  %v872_v45 = vpop.f32.mrb[14].mxu0  ;;  %v785_v46 = vunpack.c.l.bf16 %v783_v40 }
 0x11b   : > { %v881_v47 = vsub.f32 %v1805_v50, %v877_v41  ;;  %v873_v48 = vpop.f32.mrb[15].mxu0  ;;  %v786_v49 = vmul.f32 %v784_v43, %v1807_v52 }
 0x11c   : > { %v882_v51 = vsub.f32 %v1809_v53, %v878_v44  ;;  %v787_v54 = vmul.f32 %v785_v46, %v1812_v56  ;;  %v1074_v48 = vpop.permute.xlu0 %1073 }
 0x11d   : > { %v883_v55 = vpack.c.bf16 %v881_v47, %v881_v47 }
 0x11e   : > { %v884_v57 = vpack.c.bf16 %v882_v51, %v882_v51  ;;  %v1079_v51 = vpop.permute.xlu1 %1078 }
 0x11f   : > { %v1327_v58 = vmul.bf16 3216621497, %v883_v55 }
 0x120   : > { %v1472_v59 = vpop.eup %1471  ;;  %v1328_v60 = vmul.bf16 3216621497, %v884_v57 }
 0x121   : > { %v1474_v61 = vpop.eup %1473  ;;  %v663_v62 = vadd.bf16 1065369472, %v1472_v59  ;;  %1479 = vpow.bf16 %v1327_v58 }
 0x122   : > { %v1476_v63 = vpop.eup %1475  ;;  %v664_v0 = vadd.bf16 1065369472, %v1474_v61  ;;  %1481 = vpow.bf16 %v1328_v60 }
 0x123   : > { %v1478_v1 = vpop.eup %1477  ;;  %v551_v50 = vmul.bf16 1065369472, %v1476_v63  ;;  %1483 = vrcp.bf16 %v663_v62 }
 0x124   : > { %v553_v2 = vmul.bf16 1065369472, %v1478_v1  ;;  %1485 = vrcp.bf16 %v664_v0 }
 0x125   : > { %v554_v52 = vunpack.c.l.bf16 %v551_v50  ;;  %v1084_v50 = vpop.permute.xlu1 %1083 }
 0x126   : > { %v555_v53 = vunpack.c.l.bf16 %v553_v2 }
 0x127   : > { %v556_v56 = vmul.f32 %v554_v52, %v1817_v4 }
 0x128   : > { %v557_v5 = vmul.f32 %v555_v53, %v1820_v6 }
 0x12c   : > { %v1480_v7 = vpop.eup %1479 }
 0x12d   : > { %v1482_v8 = vpop.eup %1481  ;;  %v893_v9 = vadd.bf16 1065369472, %v1480_v7 }
 0x12e   : > { %v1484_v10 = vpop.eup %1483  ;;  %v894_v11 = vadd.bf16 1065369472, %v1482_v8 }
 0x12f   : > { %v1486_v12 = vpop.eup %1485  ;;  %v666_v13 = vmul.bf16 1065369472, %v1484_v10  ;;  %1487 = vrcp.bf16 %v893_v9 }
 0x130   : > { %v668_v14 = vmul.bf16 1065369472, %v1486_v12  ;;  %1489 = vrcp.bf16 %v894_v11 }
 0x131   : > { %v669_v15 = vunpack.c.l.bf16 %v666_v13 }
 0x132   : > { %v670_v16 = vunpack.c.l.bf16 %v668_v14 }
 0x133   : > { %v671_v17 = vmul.f32 %v669_v15, %v1825_v20  ;;  %v675_v18 = vadd.f32 %v669_v15, %v554_v52 }
 0x134   : > { %v672_v19 = vmul.f32 %v670_v16, %v1828_v22  ;;  %v676_v4 = vadd.f32 %v670_v16, %v555_v53 }
 0x135   : > { %v673_v21 = vadd.f32 %v671_v17, %v556_v56  ;;  %v790_v6 = vadd.f32 %v784_v43, %v675_v18 }
 0x136   : > { %v674_v23 = vadd.f32 %v672_v19, %v557_v5  ;;  %v791_v24 = vadd.f32 %v785_v46, %v676_v4  ;;  %v1089_v5 = vpop.permute.xlu0 %1088 }
 0x137   : > { %v788_v25 = vadd.f32 %v786_v49, %v673_v21 }
 0x138   : > { %v789_v26 = vadd.f32 %v787_v54, %v674_v23 }
 0x13a   : > { %v1488_v27 = vpop.eup %1487 }
 0x13b   : > { %v1490_v28 = vpop.eup %1489  ;;  %v896_v29 = vmul.bf16 1065369472, %v1488_v27 }
 0x13c   : > { %v898_v30 = vmul.bf16 1065369472, %v1490_v28 }
 0x13d   : > { %v899_v31 = vunpack.c.l.bf16 %v896_v29 }
 0x13e   : > { %v900_v32 = vunpack.c.l.bf16 %v898_v30 }
 0x13f   : > { %v901_v33 = vmul.f32 %v899_v31, %v868_v39  ;;  %v905_v34 = vadd.f32 %v899_v31, %v790_v6  ;;  %v1457_v39 = vld [vmem:[%s1916_s5] sm:$0xff]  }
 0x140   : > { %v902_v35 = vmul.f32 %v900_v32, %v870_v42  ;;  %v906_v20 = vadd.f32 %v900_v32, %v791_v24  ;;  %v1458_v42 = vld [vmem:[%s1916_s5 + $0x8] sm:$0xff]  }
 0x141   : > { %v903_v36 = vadd.f32 %v901_v33, %v788_v25  ;;  %v907_v37 = vadd.f32 1e-06, %v905_v34 }
 0x142   : > { %v904_v22 = vadd.f32 %v902_v35, %v789_v26  ;;  %v908_v38 = vadd.f32 1e-06, %v906_v20 }
 0x143   : > { %1491 = vrcp.f32 %v907_v37 }
 0x144   : > { %1493 = vrcp.f32 %v908_v38 }
 0x14d   : > { %v1492_v40 = vpop.eup %1491 }
 0x14e   : > { %v1494_v41 = vpop.eup %1493  ;;  %v911_v43 = vmul.f32 %v1492_v40, %v903_v36 }
 0x14f   : > { %v912_v44 = vmul.f32 %v1494_v41, %v904_v22 }
 0x150   : > { %v917_v45 = vpack.c.bf16 %v911_v43, %v911_v43 }
 0x151   : > { %v918_v46 = vpack.c.bf16 %v912_v44, %v912_v44 }
 0x152   : > { %v1009_v47 = vsel %vm400_vm0, %v917_v45, 0 }
 0x153   : > { %1336 = vmatprep.subr.msk.bf16.mxu1 %vm400_vm0, %v918_v46 }
 0x154   : > { %1015 = vmatpush1.bf16.msra.mxu1 %v1009_v47 }
 0x157   : > { %1337 = vmatmul.mubr.msk.bf16.vlgmr.msra.gmra.mrb[4].mxu1 %vm396_vm1, %v1457_v39 }
 0x158   : > { %1056 = vmatprep.mubr.bf16.mxu1 %v1575_v3 }
 0x15f   : > { %1338 = vmatmul.mubr.msk.bf16.gmra.mrb[8].mxu1 %vm396_vm1, %v1458_v42 }
 0x22a   : > { %v1048_v49 = vpop.f32.mrb[4].mxu1 }
 0x22b   : > { %v1091_v54 = vadd.f32 %v1074_v48, %v1048_v49  ;;  %v1050_v55 = vpop.f32.mrb[5].mxu1 }
 0x22c   : > { %v1092_v57 = vadd.f32 %v1074_v48, %v1050_v55  ;;  %v1052_v58 = vpop.f32.mrb[6].mxu1 }
 0x22d   : > { %v1099_v59 = vmax.f32 %v1091_v54, 0.0  ;;  %v1093_v60 = vadd.f32 %v1079_v51, %v1052_v58  ;;  %v1054_v61 = vpop.f32.mrb[7].mxu1 }
 0x22e   : > { %v1100_v3 = vmax.f32 %v1092_v57, 0.0  ;;  %v1094_v62 = vadd.f32 %v1079_v51, %v1054_v61 }
 0x22f   : > { %v1101_v63 = vmax.f32 %v1093_v60, 0.0 }
 0x230   : > { %v1350_v0 = vpack.c.bf16 %v1100_v3, %v1099_v59  ;;  %v1102_v1 = vmax.f32 %v1094_v62, 0.0 }
 0x232   : > { %1131 = vst [vmem:[%s354_s21] sm:$0xff] %v1350_v0  ;;  %v1351_v2 = vpack.c.bf16 %v1102_v1, %v1101_v63  ;;  %v1058_v52 = vpop.f32.mrb[8].mxu1 }
 0x233   : > { %v1095_v53 = vadd.f32 %v1084_v50, %v1058_v52  ;;  %v1060_v56 = vpop.f32.mrb[9].mxu1 }
 0x234   : > { %1132 = vst [vmem:[%s354_s21 + $0x8] sm:$0xff] %v1351_v2  ;;  %v1096_v7 = vadd.f32 %v1084_v50, %v1060_v56  ;;  %v1062_v8 = vpop.f32.mrb[10].mxu1 }
 0x235   : > { %v1103_v9 = vmax.f32 %v1095_v53, 0.0  ;;  %v1097_v10 = vadd.f32 %v1089_v5, %v1062_v8  ;;  %v1064_v11 = vpop.f32.mrb[11].mxu1 }
 0x236   : > { %v1104_v12 = vmax.f32 %v1096_v7, 0.0  ;;  %v1098_v13 = vadd.f32 %v1089_v5, %v1064_v11 }
 0x237   : > { %v1105_v14 = vmax.f32 %v1097_v10, 0.0 }
 0x238   : > { %v1352_v15 = vpack.c.bf16 %v1104_v12, %v1103_v9  ;;  %v1106_v16 = vmax.f32 %v1098_v13, 0.0 }
 0x23a   : > { %1133 = vst [vmem:[%s354_s21 + $0x10] sm:$0xff] %v1352_v15  ;;  %v1353_v17 = vpack.c.bf16 %v1106_v16, %v1105_v14 }
 0x23c   : > { %1134 = vst [vmem:[%s354_s21 + $0x18] sm:$0xff] %v1353_v17 }
 0x23d   : > { %1508 = shalt.err (!%p1505_p5)
}
 0x23e   : > { %s1509_s19 = scalar_lea.hbm %s1861_s25, 512  ;;  %s1513_s23 = scalar_lea.hbm %s1919_s8, 1024 }
 0x23f   : > { %p1510_p6 = scmp.ne.s32.totalorder %s1861_s25, %s1509_s19  ;;  %p1514_p10 = scmp.lt.u32.totalorder %s1861_s25, %s1919_s8 }
 0x240   : > { %p1515_p11 = scmp.lt.u32.totalorder %s1513_s23, %s1509_s19  ;;  %p1517_p13 = scmp.lt.u32.totalorder %s1509_s19, %s1861_s25 }
 0x241   : > { %p1511_p7 = pnand %p1510_p6, %p1664_p4 }
 0x242   : > { %p1516_p12 = por %p1515_p11, %p1514_p10 }
 0x243   : > { %p1512_p9 = pneg %p1511_p7 }
 0x244   : > { %p1518_p0 = por %p1517_p13, %p1516_p12 }
 0x246   : > { %p1519_p1 = pnand %p1518_p0, %p1512_p9 }
 0x248   : > { %1522 = shalt.err (!%p1519_p1)
}
 0x249   : > { %s1577_s30 = smov 128   ;;  %s1578_s12 = smov 8  }
 0x24a   : > { %1363 = dma.vmem_to_hbm [thread:$0]  (%p1664_p4), %s1856_s22, 512, %s1861_s25, %s1865_s11, %s1577_s30, %s1577_s30, %s1578_s12  }
 0x24b PF: > { %p1369_p2 = scmp.ge.s32.totalorder %s1573_s10, 2  ;;  %s1166_s14 = sand.u32 1, %s1553_s27  }
 0x24c   : > { %s1167_s16 = scalar_lea.sflag [#allocation3], %s1166_s14 }
 0x24d   : > { %p1366_p3 = pnand %p1369_p2, %p1671_p8 }
 0x24f   : > { %1548 = dma.done.wait (!%p1366_p3), %s1167_s16, 512  }
 0x250   : > { %1550 = vsyncadd (!%p1366_p3), %s1167_s16, 4294966784  ;;  %s21_s10 = sadd.s32 1, %s1573_s10   ;;  %s1922_s27 = smov %s1557_s28 }
 0x251   : > { %p18_p5 = scmp.ge.s32.totalorder %s21_s10, 4   ;;  %s1923_s28 = smov %s1561_s29 }
 0x252   : > { %s1924_s29 = smov %s1677_s18  ;;  %s1925_s30 = smov %s1569_s9 }
 0x253   : > { %s1926_s9 = smov %s1928_s13  ;;  %20 = sbr.rel (!%p18_p5) target bundleno = 4 (0x4), region = 99 }
 0x25a   :  { %1172 = vsyncpa [#allocation3], 1 }
 0x25b   :  { %1174 = vsyncpa [#allocation3 + $0x1], 1 }

</bundles_post_ra>
